<compile_context>
chip_gen: v7x
topology: tpu7x:2x2x1
jax: 0.10.0
libtpu: 0.0.40
codegen_flags: <defaults>
</compile_context>

<pallas_src>
import numpy as np
import jax
import jax.numpy as jnp
from jax.experimental import pallas as pl
from jax.experimental.pallas import tpu as pltpu


def _rup(v, m):
    return (v + m - 1) // m * m


def make_pinn_kernel(n_hidden_layers, n_input, K0_pad, nh_pad, nout_pad, K_total,
                     row_offs):
    """Kernel for a dense-skip PINN in transposed (features, points) layout.

    refs: x_ref (n_input, tm), w_ref (rows_total, K_slab), o_ref (nout_pad, tm),
          concat_ref VMEM scratch (K_total, tm).
    """

    def kernel(x_ref, w_ref, o_ref, concat_ref):
        tm = concat_ref.shape[1]

        # Stage the raw input rows (lane-dense), then build the constant ones row
        # (bias trick) and the zero pad rows of the first segment in-kernel.
        concat_ref[pl.ds(0, n_input), :] = x_ref[...].astype(jnp.float32)
        concat_ref[pl.ds(n_input, 1), :] = jnp.ones((1, tm), jnp.float32)
        pad0 = K0_pad - n_input - 1
        if pad0 > 0:
            concat_ref[pl.ds(n_input + 1, pad0), :] = jnp.zeros((pad0, tm),
                                                                jnp.float32)

        # Hidden layers: one MXU matmul per layer against the growing concat prefix.
        # K stays the exact (8-aligned) prefix: the MXU is idle at these sizes, and
        # 128-aligning K would require per-step zero fills that cost more than the
        # small masked weight loads they remove.
        for i in range(n_hidden_layers):
            k_i = K0_pad + i * nh_pad
            r0 = row_offs[i]
            w = w_ref[pl.ds(r0, nh_pad), pl.ds(0, k_i)]              # (nh_pad, k_i)
            z = jnp.dot(w, concat_ref[pl.ds(0, k_i), :],
                        preferred_element_type=jnp.float32)          # (nh_pad, tm)
            # sin activation (activ_fn='s'; first layer is sin per forward()).
            # Padded weight rows are zero -> sin(0) = 0 -> padded concat rows are 0.
            concat_ref[pl.ds(k_i, nh_pad), :] = jnp.sin(z)

        # Output layer (no activation, complex_output=False).  Full-sublane,
        # lane-dense store; the real n_output rows are cropped in the wrapper.
        r0 = row_offs[n_hidden_layers]
        w = w_ref[pl.ds(r0, nout_pad), pl.ds(0, K_total)]            # (nout_pad, K_total)
        z = jnp.dot(w, concat_ref[...], preferred_element_type=jnp.float32)
        o_ref[...] = z.astype(o_ref.dtype)

    return kernel


def _choose_tiling(n_points, n_input, K_total, nout_pad, rows_total, K_slab,
                   tm=None, vmem_budget=24 << 20):
    """Pick the points-tile tm (multiple of 128) and the padded point count."""
    if tm is None:
        # Per-point-column VMEM bytes: concat scratch + double-buffered x/out tiles.
        per_col = 4 * (K_total + 2 * n_input + 2 * nout_pad)
        budget = vmem_budget - 2 * 4 * rows_total * K_slab   # resident param slab
        tm = max(128, min(8192, max(0, budget) // per_col // 128 * 128))
        # Keep >= 2 grid steps when possible (v7x: two TensorCores share the
        # "parallel" axis); for tiny inputs fall back to a single 128 tile.
        tm = min(tm, max(128, _rup((n_points + 1) // 2, 128)))
    else:
        assert tm % 128 == 0
    n_pad = _rup(n_points, tm)
    steps = n_pad // tm
    # Even step count for megacore balance when the extra tile is cheap (<13% waste).
    if steps >= 8 and steps % 2 == 1:
        n_pad += tm
    return tm, n_pad


def pinn_forward_pallas(x, params, tm=None):
    """
    x:      (n_points, n_input) float32
    params: list of (W, b) PyTorch-Linear-style pairs, W: (out, in), b: (out,).
            Last pair is the output layer; the rest are hidden layers (dense=True).
    Returns (n_points, n_output), matching the PyTorch module's forward.
    """
    n_points, n_input = x.shape
    n_hidden_layers = len(params) - 1
    n_hidden = params[0][0].shape[0] if n_hidden_layers > 0 else 0
    n_output = params[-1][0].shape[0]

    # Padded row-segment sizes for the transposed concat buffer.
    K0_pad = _rup(n_input + 1, 8)                     # x rows + ones (bias) row
    nh_pad = _rup(n_hidden, 8) if n_hidden_layers > 0 else 0
    nout_pad = _rup(n_output, 8)
    K_total = K0_pad + n_hidden_layers * nh_pad       # full concat depth (mult of 8)
    K_slab = _rup(max(K_total, 128), 128)             # lane-pad the parameter slab
    rows_total = n_hidden_layers * nh_pad + nout_pad

    tm, n_pad = _choose_tiling(n_points, n_input, K_total, nout_pad,
                               rows_total, K_slab, tm)

    # ---- Pack all weights (+ biases as an extra column) into one zero slab. ----
    slab = np.zeros((rows_total, K_slab), np.float32)
    row_offs = []

    def fill(row0, W, b):
        Wn = np.asarray(W, np.float32)
        bn = np.asarray(b, np.float32)
        out_dim, in_dim = Wn.shape
        # x block.
        slab[row0:row0 + out_dim, 0:n_input] = Wn[:, 0:n_input]
        # bias column (the concat buffer holds a constant-ones row at index n_input).
        slab[row0:row0 + out_dim, n_input] = bn
        # dense-skip blocks: PyTorch concat order is [x, h0, h1, ...].
        n_prev = 0 if n_hidden == 0 else (in_dim - n_input) // n_hidden
        for j in range(n_prev):
            src = Wn[:, n_input + j * n_hidden: n_input + (j + 1) * n_hidden]
            dst = K0_pad + j * nh_pad
            slab[row0:row0 + out_dim, dst:dst + n_hidden] = src

    r = 0
    for i in range(n_hidden_layers):
        W, b = params[i]
        row_offs.append(r)
        fill(r, W, b)
        r += nh_pad
    W, b = params[-1]
    row_offs.append(r)
    fill(r, W, b)
    slab = jnp.asarray(slab)

    # ---- Transposed, lane-dense input (n_input, n_pad); ones row built in-kernel. --
    xT = jnp.asarray(x).T.astype(jnp.float32)                      # (n_input, n_points)
    if n_pad != n_points:
        xT = jnp.pad(xT, ((0, 0), (0, n_pad - n_points)))

    kernel = make_pinn_kernel(n_hidden_layers, n_input, K0_pad, nh_pad, nout_pad,
                              K_total, row_offs)
    grid = (n_pad // tm,)

    out_t = pl.pallas_call(
        kernel,
        out_shape=jax.ShapeDtypeStruct((nout_pad, n_pad), x.dtype),
        grid_spec=pltpu.PrefetchScalarGridSpec(
            num_scalar_prefetch=0,
            grid=grid,
            in_specs=[
                pl.BlockSpec((n_input, tm), lambda i: (0, i)),        # x tile (lane-dense)
                pl.BlockSpec((rows_total, K_slab), lambda i: (0, 0)),  # resident params
            ],
            out_specs=pl.BlockSpec((nout_pad, tm), lambda i: (0, i)),  # full-sublane store
            scratch_shapes=[pltpu.VMEM((K_total, tm), jnp.float32)],   # concat buffer
        ),
        compiler_params=pltpu.CompilerParams(
            dimension_semantics=("parallel",),
            vmem_limit_bytes=32 * 1024 * 1024,
        ),
    )(xT, slab)

    # Crop padded rows/points and return in the module's (n_points, n_output) layout.
    return out_t[:n_output, :n_points].T


def pinn_forward_ref(x, params):
    """Pure-JAX reference of the PyTorch forward (dense=True, sine activations)."""
    n_hidden_layers = len(params) - 1
    for i in range(n_hidden_layers):
        W, b = params[i]
        y = jnp.sin(x @ W.T + b)
        x = jnp.concatenate([x, y], axis=1)       # dense connections
    W, b = params[-1]
    return x @ W.T + b


def init_pinn_params(key, n_input, n_output, n_layers, n_hidden, c=6.0):
    """SIREN-style deterministic init (first layer std 1/n_in, others sqrt(c/n_in))."""
    params = []
    dims_in = []
    d = n_input
    for _ in range(n_layers - 1):
        dims_in.append((d, n_hidden))
        d += n_hidden                              # dense=True: input width grows
    dims_in.append((d, n_output))                  # output layer (complex_output=False)

    for i, (fan_in, fan_out) in enumerate(dims_in):
        key, kw, kb = jax.random.split(key, 3)
        if i == 0:
            w_std = 1.0 / fan_in
        else:
            w_std = float(np.sqrt(c / fan_in))
        W = jax.random.uniform(kw, (fan_out, fan_in), jnp.float32, -w_std, w_std)
        # PyTorch Linear default bias init: U(-1/sqrt(fan_in), 1/sqrt(fan_in))
        b_bound = 1.0 / float(np.sqrt(fan_in))
        b = jax.random.uniform(kb, (fan_out,), jnp.float32, -b_bound, b_bound)
        params.append((W, b))
    return params


if __name__ == "__main__":
    # Small PINN config: n_input=4, n_output=4, n_layers=3 (2 hidden + output), n_hidden=32
    n_input, n_output, n_layers, n_hidden = 4, 4, 3, 32
    n_points = 256

    key = jax.random.PRNGKey(0)
    key, kx = jax.random.split(key)
    x = jax.random.normal(kx, (n_points, n_input), jnp.float32)

    params = init_pinn_params(key, n_input, n_output, n_layers, n_hidden)

    out = pinn_forward_pallas(x, params)          # tm auto -> 128, grid = 2 steps
    out = jax.block_until_ready(out)

    ref = pinn_forward_ref(x, params)
    np.testing.assert_allclose(np.asarray(out), np.asarray(ref), rtol=1e-5, atol=1e-5)

    print("KERNEL_OK")
</pallas_src>

<mosaic_0001>
module attributes {stable_mosaic.version = 11 : i64} {
  func.func @kernel(%arg0: i32, %arg1: memref<4x128xf32, #tpu.memory_space<vmem>>, %arg2: memref<72x128xf32, #tpu.memory_space<vmem>>, %arg3: memref<8x128xf32, #tpu.memory_space<vmem>>, %arg4: memref<72x128xf32, #tpu.memory_space<vmem>>) attributes {dimension_semantics = [#tpu.dimension_semantics<parallel>], iteration_bounds = array<i64: 2>, scalar_prefetch = 0 : i64, scratch_operands = 1 : i64, tpu.core_type = #tpu.core_type<tc>, window_params = [{transform_indices = @transform_0, window_bounds = array<i64: 4, 128>}, {pipeline_mode = #tpu.pipeline_mode<synchronous>, transform_indices = @transform_1, window_bounds = array<i64: 72, 128>}, {transform_indices = @transform_2, window_bounds = array<i64: 8, 128>}]} {
    %c0 = arith.constant 0 : index
    %c0_0 = arith.constant 0 : index
    %0 = vector.load %arg1[%c0, %c0_0] : memref<4x128xf32, #tpu.memory_space<vmem>>, vector<4x128xf32>
    %c0_1 = arith.constant 0 : index
    %c0_2 = arith.constant 0 : index
    %1 = vector.load %arg4[%c0_1, %c0_2] : memref<72x128xf32, #tpu.memory_space<vmem>>, vector<4x128xf32>
    tpu.vector_store %arg4[%c0_1, %c0_2], %0 {strides = array<i32>} : memref<72x128xf32, #tpu.memory_space<vmem>>, vector<4x128xf32>,
    %cst = arith.constant 1.000000e+00 : f32
    %2 = vector.broadcast %cst : f32 to vector<1x128xf32>
    %c4 = arith.constant 4 : index
    %c0_3 = arith.constant 0 : index
    %3 = vector.load %arg4[%c4, %c0_3] : memref<72x128xf32, #tpu.memory_space<vmem>>, vector<1x128xf32>
    tpu.vector_store %arg4[%c4, %c0_3], %2 {strides = array<i32>} : memref<72x128xf32, #tpu.memory_space<vmem>>, vector<1x128xf32>,
    %cst_4 = arith.constant 0.000000e+00 : f32
    %4 = vector.broadcast %cst_4 : f32 to vector<3x128xf32>
    %c5 = arith.constant 5 : index
    %c0_5 = arith.constant 0 : index
    %5 = vector.load %arg4[%c5, %c0_5] : memref<72x128xf32, #tpu.memory_space<vmem>>, vector<3x128xf32>
    tpu.vector_store %arg4[%c5, %c0_5], %4 {strides = array<i32>} : memref<72x128xf32, #tpu.memory_space<vmem>>, vector<3x128xf32>,
    %c0_6 = arith.constant 0 : index
    %c0_7 = arith.constant 0 : index
    %6 = vector.load %arg2[%c0_6, %c0_7] : memref<72x128xf32, #tpu.memory_space<vmem>>, vector<32x8xf32>
    %c0_8 = arith.constant 0 : index
    %c0_9 = arith.constant 0 : index
    %7 = vector.load %arg4[%c0_8, %c0_9] : memref<72x128xf32, #tpu.memory_space<vmem>>, vector<8x128xf32>
    %cst_10 = arith.constant dense<0.000000e+00> : vector<32x128xf32>
    %8 = tpu.matmul %6, %7, %cst_10 {dimension_numbers = #tpu.dot_dimension_numbers<[1], [0], [0], [1], [0, 0, 1, 1], [], []>} : vector<32x8xf32>, vector<8x128xf32>, vector<32x128xf32> -> vector<32x128xf32>
    %9 = math.sin %8 : vector<32x128xf32>
    %c8 = arith.constant 8 : index
    %c0_11 = arith.constant 0 : index
    %10 = vector.load %arg4[%c8, %c0_11] : memref<72x128xf32, #tpu.memory_space<vmem>>, vector<32x128xf32>
    tpu.vector_store %arg4[%c8, %c0_11], %9 {strides = array<i32>} : memref<72x128xf32, #tpu.memory_space<vmem>>, vector<32x128xf32>,
    %c32 = arith.constant 32 : index
    %c0_12 = arith.constant 0 : index
    %11 = vector.load %arg2[%c32, %c0_12] : memref<72x128xf32, #tpu.memory_space<vmem>>, vector<32x40xf32>
    %c0_13 = arith.constant 0 : index
    %c0_14 = arith.constant 0 : index
    %12 = vector.load %arg4[%c0_13, %c0_14] : memref<72x128xf32, #tpu.memory_space<vmem>>, vector<40x128xf32>
    %cst_15 = arith.constant dense<0.000000e+00> : vector<32x128xf32>
    %13 = tpu.matmul %11, %12, %cst_15 {dimension_numbers = #tpu.dot_dimension_numbers<[1], [0], [0], [1], [0, 0, 1, 1], [], []>} : vector<32x40xf32>, vector<40x128xf32>, vector<32x128xf32> -> vector<32x128xf32>
    %14 = math.sin %13 : vector<32x128xf32>
    %c40 = arith.constant 40 : index
    %c0_16 = arith.constant 0 : index
    %15 = vector.load %arg4[%c40, %c0_16] : memref<72x128xf32, #tpu.memory_space<vmem>>, vector<32x128xf32>
    tpu.vector_store %arg4[%c40, %c0_16], %14 {strides = array<i32>} : memref<72x128xf32, #tpu.memory_space<vmem>>, vector<32x128xf32>,
    %c64 = arith.constant 64 : index
    %c0_17 = arith.constant 0 : index
    %16 = vector.load %arg2[%c64, %c0_17] : memref<72x128xf32, #tpu.memory_space<vmem>>, vector<8x72xf32>
    %c0_18 = arith.constant 0 : index
    %c0_19 = arith.constant 0 : index
    %17 = vector.load %arg4[%c0_18, %c0_19] : memref<72x128xf32, #tpu.memory_space<vmem>>, vector<72x128xf32>
    %cst_20 = arith.constant dense<0.000000e+00> : vector<8x128xf32>
    %18 = tpu.matmul %16, %17, %cst_20 {dimension_numbers = #tpu.dot_dimension_numbers<[1], [0], [0], [1], [0, 0, 1, 1], [], []>} : vector<8x72xf32>, vector<72x128xf32>, vector<8x128xf32> -> vector<8x128xf32>
    %c0_21 = arith.constant 0 : index
    %c0_22 = arith.constant 0 : index
    %19 = vector.load %arg3[%c0_21, %c0_22] : memref<8x128xf32, #tpu.memory_space<vmem>>, vector<8x128xf32>
    tpu.vector_store %arg3[%c0_21, %c0_22], %18 {strides = array<i32>} : memref<8x128xf32, #tpu.memory_space<vmem>>, vector<8x128xf32>,
    return
  }
  func.func @transform_0(%arg0: i32) -> (i32, i32) {
    %c0_i32 = arith.constant 0 : i32
    %c0_i32_0 = arith.constant 0 : i32
    return %c0_i32, %arg0 : i32, i32
  }
  func.func @transform_1(%arg0: i32) -> (i32, i32) {
    %c0_i32 = arith.constant 0 : i32
    %c0_i32_0 = arith.constant 0 : i32
    %c0_i32_1 = arith.constant 0 : i32
    return %c0_i32, %c0_i32_0 : i32, i32
  }
  func.func @transform_2(%arg0: i32) -> (i32, i32) {
    %c0_i32 = arith.constant 0 : i32
    %c0_i32_0 = arith.constant 0 : i32
    return %c0_i32, %arg0 : i32, i32
  }
}

</mosaic_0001>

<bundles_post_ra>
// kernel: tpu_custom_call.1
= control target key start
LH: loop header
LB: loop body
LE: loop exit
PB: predicated region body
PF: predicated region fallthrough
CT: control target
= control target key end

     0   :  { %7 = vsyncpa [#allocation4], 0  ;;  %s2607_s0 = inlined_call_operand.hbm [shape: f32[4,256], index: 0, kind: input, shape index: {}]   ;;  %s2608_s1 = inlined_call_operand.hbm [shape: f32[72,128], index: 1, kind: input, shape index: {}]   ;;  %s2609_s2 = inlined_call_operand.hbm [shape: f32[8,256], index: 2, kind: output, shape index: {}]  }
   0x1   :  { %9 = vsyncpa [#allocation4 + $0x1], 0 }
   0x2   :  { %10 = vsyncpa [#allocation7], 0 }
   0x3   :  { %11 = vsyncpa [#allocation5], 0 }
   0x4   :  { %13 = vsyncpa [#allocation5 + $0x1], 0  ;;  %s1844_s9 = smov 0   ;;  %s1846_s10 = smov 0  }
   0x5   :  { %s1848_s11 = smov 0   ;;  %s1850_s12 = smov 0  }
   0x6 LB: > { %s1865_s13 = sadd.s32 4294967295, %s1812_s12   ;;  %s1407_s14 = sadd.s32 4294967294, %s1812_s12   ;;  %s1812_s12 = sphi %s1850_s12, %s2637_s12   ;;  %s1808_s11 = sphi %s1848_s11, %s2636_s11   ;;  %s1804_s10 = sphi %s1846_s10, %s2635_s10   ;;  %s1800_s9 = sphi %s1844_s9, %s2634_s9  }
   0x7   : > { %p39_p0 = scmp.ne.s32.totalorder %s1804_s10, %s1800_s9  ;;  %p2610_p1 = scmp.eq.s32.totalorder %s1865_s13, 0 }
   0x8   : > { %p90_p3 = scmp.eq.s32.totalorder %s1407_s14, 1  ;;  %p1408_p5 = scmp.ge.s32.totalorder %s1812_s12, 1 }
   0x9   : > { %p1874_p4 = por %p2610_p1, %p39_p0  ;;  %p97_p7 = scmp.lt.s32.totalorder %s1812_s12, 3 }
   0xa   : > { %p1879_p6 = por %p90_p3, %p39_p0  ;;  %s1814_s18 = smov [#allocation6]  }
   0xb   : > { %s2613_s15 = scalar_select %p1874_p4, 1, 0 }
   0xc   : > { %s2614_s16 = scalar_select %p1879_p6, 1, 0 }
   0xd   : > { %p1884_p8 = pnand %p1408_p5, %p97_p7  ;;  %s109_s19 = sshll.u32 %s1814_s18, 4  ;;  %s1888_s19 = int_to_ptr.vmem [resolvable:$true] %s109_s19 }
   0xe   : > { %s1900_s21 = sadd.s32 1, %s1812_s12   ;;  %s26_s22 = sadd.s32 1, %s1808_s11 }
   0xf   : > { %s2615_s17 = scalar_select %p1884_p8, 1, 0 }
  0x10   : > { %p1591_p9 = pneg %p1884_p8  ;;  %s23_s23 = ssub.s32 %s1812_s12, %s1900_s21 }
  0x11   : > { %s1684_s26 = scalar_lea.hbm %s2608_s1, 1152 }
  0x12   : > { %p1895_p11 = pnand %p1591_p9, %p2610_p1  ;;  %p1685_p12 = scmp.ne.s32.totalorder %s2608_s1, %s1684_s26 }
  0x13   : > { %p1691_p5 = scmp.lt.u32.totalorder %s1684_s26, %s2608_s1 }
  0x14   : > { %p1686_p13 = pneg %p1895_p11 }
  0x16   : > { %p1687_p0 = pnand %p1686_p13, %p1685_p12 }
  0x18   : > { %p1688_p3 = pneg %p1687_p0 }
  0x1a   : > { %p1693_p7 = pnand %p1691_p5, %p1688_p3 }
  0x1c   : > { %1696 = shalt.err (!%p1693_p7)
}
  0x1d   : > { %s1697_s3 = scalar_lea.vmem %s1888_s19, 1152  ;;  %p1705_p2 = scmp.lt.s32.totalorder %s1888_s19, %s1888_s19 }
  0x1e   : > { %p1698_p9 = scmp.ne.s32.totalorder %s1888_s19, %s1697_s3  ;;  %p1706_p6 = scmp.lt.s32.totalorder %s1697_s3, %s1697_s3 }
  0x20   : > { %p1700_p10 = pnand %p1698_p9, %p1686_p13  ;;  %p1707_p4 = por %p1706_p6, %p1705_p2 }
  0x22   : > { %p1701_p1 = pneg %p1700_p10 }
  0x24   : > { %p1708_p8 = pnand %p1707_p4, %p1701_p1 }
  0x26   : > { %1711 = shalt.err (!%p1708_p8)
}
  0x27   : > { %s1815_s4 = smov 128   ;;  %s1816_s5 = smov 8  }
  0x28   : > { %1594 = dma.hbm_to_vmem [thread:$0]  (!%p1895_p11), %s2608_s1, 1152, %s1888_s19, [#allocation7], %s1815_s4, %s1815_s4, %s1816_s5  }
  0x29   : > { %p24_p2 = scmp.eq.s32.totalorder %s23_s23, 0  ;;  %p33_p1 = scmp.ne.s32.totalorder %s1808_s11, %s1804_s10 }
  0x2a   : > { %p34_p4 = scmp.eq.s32.totalorder %s1812_s12, 0  ;;  %p1604_p6 = scmp.lt.s32.totalorder %s1812_s12, 2 }
  0x2b   : > { %s1931_s8 = scalar_select %p24_p2, %s1808_s11, %s26_s22  }
  0x2c   : > { %p35_p8 = por %p34_p4, %p33_p1  ;;  %p2617_p10 = scmp.eq.s32.totalorder %s1865_s13, 1 }
  0x2d   : > { %s123_s18 = sand.u32 1, %s1808_s11   ;;  %s1412_s24 = sshll.u32 %s1812_s12, 6 }
  0x2e   : > { %p1935_p12 = por %p2617_p10, %p33_p1  ;;  %s1411_s25 = sshll.u32 %s123_s18, 2 }
  0x2f   : > { %s1944_s27 = scalar_lea.hbm %s2607_s0, %s1412_s24  ;;  %s127_s19 = scalar_lea.vmem [#allocation3], %s1411_s25 }
  0x30   : > { %s134_s22 = sshll.u32 %s127_s19, 4  ;;  %p1946_p11 = pnand %p1604_p6, %p35_p8  ;;  %s1950_s22 = int_to_ptr.vmem [resolvable:$true] %s134_s22 }
  0x31   : > { %s124_s28 = scalar_lea.sflag [#allocation4], %s123_s18  ;;  %s1712_s29 = scalar_lea.hbm %s1944_s27, 64 }
  0x32   : > { %p1713_p13 = scmp.ne.s32.totalorder %s1944_s27, %s1712_s29  ;;  %p1714_p0 = pneg %p1946_p11 }
  0x33   : > { %s1717_s4 = scalar_lea.hbm %s2607_s0, 128  ;;  %p1718_p7 = scmp.lt.u32.totalorder %s1944_s27, %s2607_s0 }
  0x34   : > { %p1715_p3 = pnand %p1714_p0, %p1713_p13  ;;  %p1719_p9 = scmp.lt.u32.totalorder %s1717_s4, %s1712_s29 }
  0x35   : > { %p1721_p1 = scmp.lt.u32.totalorder %s1712_s29, %s1944_s27 }
  0x36   : > { %p1716_p5 = pneg %p1715_p3  ;;  %p1720_p2 = por %p1719_p9, %p1718_p7 }
  0x38   : > { %p1722_p4 = por %p1721_p1, %p1720_p2 }
  0x3a   : > { %p1723_p6 = pnand %p1722_p4, %p1716_p5 }
  0x3c   : > { %1726 = shalt.err (!%p1723_p6)
}
  0x3d   : > { %s1727_s7 = scalar_lea.vmem %s1950_s22, 64  ;;  %s1817_s18 = smov [#allocation3]  }
  0x3e   : > { %p1728_p8 = scmp.ne.s32.totalorder %s1950_s22, %s1727_s7  ;;  %s1732_s24 = sshll.u32 %s1817_s18, 4  ;;  %s1733_s24 = int_to_ptr.vmem [resolvable:$false] %s1732_s24 }
  0x3f   : > { %s1734_s25 = scalar_lea.vmem %s1733_s24, 128  ;;  %p1735_p3 = scmp.lt.s32.totalorder %s1950_s22, %s1733_s24 }
  0x40   : > { %p1730_p10 = pnand %p1728_p8, %p1714_p0  ;;  %p1736_p7 = scmp.lt.s32.totalorder %s1734_s25, %s1727_s7 }
  0x42   : > { %p1731_p13 = pneg %p1730_p10  ;;  %p1737_p9 = por %p1736_p7, %p1735_p3 }
  0x44   : > { %p1738_p2 = pnand %p1737_p9, %p1731_p13 }
  0x46   : > { %1741 = shalt.err (!%p1738_p2)
}
  0x47   : > { %1598 = dma.hbm_to_vmem [thread:$0]  (!%p1946_p11), %s1944_s27, 64, %s1950_s22, %s124_s28  }
  0x48   : > { %p2620_p5 = scmp.ne.s32.totalorder %s2615_s17, 0 }
  0x49   : > { %s1980_s20 = sand.u32 (!%p2620_p5), 1, %s1804_s10   ;;  %p2621_p0 = scmp.ne.s32.totalorder (!%p2620_p5), %s2613_s15, 0 }
  0x4a   : > { %143 = sbr.rel (%p2620_p5) target bundleno = 1036 (0x40c), region = 28  ;;  %s1414_s26 = sshll.u32 (!%p2620_p5), %s1980_s20, 2 }
  0x4b   : > { %s146_s19 = scalar_lea.sflag (!%p2620_p5), [#allocation4], %s1980_s20  ;;  %s149_s29 = scalar_lea.vmem (!%p2620_p5), [#allocation3], %s1414_s26 }
  0x51   : > { %1787 = dma.done.wait (%p2621_p0), %s146_s19, 64  }
  0x52   : > { %1789 = vsyncadd (%p2621_p0), %s146_s19, 4294967232  ;;  %p2622_p1 = scmp.eq.s32.totalorder %s1865_s13, 0 }
  0x54   : > { %1791 = dma.done.wait (%p2622_p1), [#allocation7], 1152   ;;  %p2623_p11 = pmov %p2622_p1 }
  0x55   : > { %v1818_v0 = vmov 1.0   ;;  %v1819_v1 = vmov 0.0   ;;  %vm183_vm0 = vcmask 64512   ;;  %v174_v2 = vld [vmem:[%s149_s29] sm:$0xf]  ;;  %v178_v3 = vld [vmem:[#allocation6] sm:$0xff] }
  0x56   : > { %1793 = vsyncadd (%p2623_p11), [#allocation7], 4294966144  ;;  %176 = vst [vmem:[#allocation2 + $0x4] sm:$0x1] %v1818_v0  ;;  %1488 = vmatprep.mubr.msk.f32.mxu1 %vm183_vm0, %v178_v3  ;;  %v179_v5 = vld [vmem:[#allocation6 + $0x8] sm:$0xff]  ;;  %v180_v6 = vld [vmem:[#allocation6 + $0x10] sm:$0xff] }
  0x57   : > { %177 = vst [vmem:[#allocation2 + $0x5] sm:$0x7] %v1819_v1  ;;  %175 = vst [vmem:[#allocation2] sm:$0xf] %v174_v2  ;;  %v181_v7 = vld [vmem:[#allocation6 + $0x18] sm:$0xff]  ;;  %vm710_vm13 = vcmask 326656  }
  0x58   : > { %v1820_v38 = vmov 683565275   ;;  %v1821_v42 = vmov 2475754826   ;;  %v1822_v44 = vmov 2131351028  }
  0x59   : > { %v1823_v46 = vmov 2102212464   ;;  %v1824_v48 = vmov 920167782   ;;  %v1825_v55 = vmov 1326507024  }
  0x5a   : > { %s1416_s15 = sshll.u32 %s1980_s20, 3  ;;  %s1459_s22 = sshll.u32 %s1865_s13, 7 }
  0x5b   : > { %s173_s17 = scalar_lea.vmem [#allocation8], %s1416_s15  ;;  %s2565_s30 = scalar_lea.hbm %s2609_s2, %s1459_s22 }
  0x5c   : > { %s1327_s27 = sshll.u32 %s173_s17, 4  ;;  %s1314_s3 = scalar_lea.sflag [#allocation5], %s1980_s20  ;;  %s2560_s27 = int_to_ptr.vmem [resolvable:$true] %s1327_s27 }
  0x5d   : > { %s1742_s4 = scalar_lea.vmem %s2560_s27, 128  ;;  %s1828_s13 = smov [#allocation8]  }
  0x5e   : > { %v1993_v4 = vld [vmem:[#allocation2] sm:$0xff]  ;;  %p1743_p4 = scmp.ne.s32.totalorder %s2560_s27, %s1742_s4  ;;  %s1746_s5 = sshll.u32 %s1828_s13, 4  ;;  %s1747_s5 = int_to_ptr.vmem [resolvable:$false] %s1746_s5 }
  0x5f   : > { %1486 = vmatprep.subr.mxu1 %v1993_v4  ;;  %s1748_s6 = scalar_lea.vmem %s1747_s5, 256  ;;  %p1749_p10 = scmp.lt.s32.totalorder %s2560_s27, %s1747_s5 }
  0x60   : > { %1487 = vmatpush3.msra.mxu1 %v1993_v4  ;;  %p1744_p6 = pnand %p1743_p4, %p1935_p12  ;;  %p1750_p13 = scmp.lt.s32.totalorder %s1748_s6, %s1742_s4 }
  0x61   : > { %1489 = vmatmul.mubr.msk.f32.vlgmr.msra.gmra.mrb[0].mxu1 %vm183_vm0, %v179_v5 }
  0x62   : > { %1491 = vmatprep.mubr.msk.f32.mxu1 %vm183_vm0, %v180_v6  ;;  %p1745_p8 = pneg %p1744_p6  ;;  %p1751_p3 = por %p1750_p13, %p1749_p10 }
  0x64   : > { %p1752_p7 = pnand %p1751_p3, %p1745_p8 }
  0x65   : > { %1492 = vmatmul.mubr.msk.f32.gmra.mrb[2].mxu1 %vm183_vm0, %v181_v7 }
 0x134   : > { %v1997_v8 = vpop.f32.mrb[0].mxu1 }
 0x135   : > { %v385_v9 = vand.u32 2147483647, %v1997_v8  ;;  %v388_v10 = vand.u32 2139095040, %v1997_v8  ;;  %v2001_v11 = vpop.f32.mrb[1].mxu1  ;;  %vm387_vm15 = vcmp.lt.s32.totalorder %v1997_v8, 0 }
 0x136   : > { %v281_v12 = vand.u32 2147483647, %v2001_v11  ;;  %v284_v13 = vand.u32 2139095040, %v2001_v11 }
 0x137   : > { %v389_v14 = vshrl.u32 %v388_v10, 23  ;;  %v392_v15 = vand.u32 8388607, %v385_v9 }
 0x138   : > { %v285_v16 = vshrl.u32 %v284_v13, 23  ;;  %v288_v17 = vand.u32 8388607, %v281_v12  ;;  %v2009_v18 = vpop.f32.mrb[2].mxu1 }
 0x139   : > { %v1425_v19 = vadd.s32 4294967169, %v389_v14  ;;  %v2011_v20 = vpop.f32.mrb[3].mxu1  ;;  %v596_v22 = vand.u32 2139095040, %v2009_v18  ;;  %v393_v24 = vor.u32 8388608, %v392_v15  ;;  %v593_v36 = vand.u32 2147483647, %v2009_v18 }
 0x13a   : > { %v1421_v21 = vadd.s32 4294967169, %v285_v16  ;;  %v289_v25 = vor.u32 8388608, %v288_v17 }
 0x13b   : > { %v395_v23 = vadd.s32 1, %v1425_v19  ;;  %v597_v27 = vshrl.u32 %v596_v22, 23  ;;  %v2014_v33 = vshll.u32 %v393_v24, 8 }
 0x13c   : > { %v291_v26 = vadd.s32 1, %v1421_v21  ;;  %v2018_v35 = vshll.u32 %v289_v25, 8 }
 0x13d   : > { %vm396_vm1 = vcmp.gt.s32.totalorder %v395_v23, 0  ;;  %v1433_v29 = vadd.s32 4294967169, %v597_v27 }
 0x13e   : > { %v397_v28 = vsel %vm396_vm1, %v395_v23, 0  ;;  %vm292_vm2 = vcmp.gt.s32.totalorder %v291_v26, 0  ;;  %vm2124_vm1 = vcmp.le.f32.partialorder %v385_v9, 0.7853982 }
 0x13f   : > { %v398_v30 = vshrl.u32 %v397_v28, 5  ;;  %v399_v31 = vand.u32 31, %v397_v28  ;;  %v293_v32 = vsel %vm292_vm2, %v291_v26, 0  ;;  %v2022_v41 = vadd.s32 1, %v1433_v29 }
 0x140   : > { %v2016_v34 = vshrl.u32 %v293_v32, 5  ;;  %v295_v40 = vand.u32 31, %v293_v32 }
 0x141   : > { %v400_v37 = vsub.s32 32, %v399_v31  ;;  %v402_v39 = vshll.u32 %v1820_v38, %v399_v31  ;;  %v405_v43 = vshll.u32 %v1821_v42, %v399_v31  ;;  %v408_v45 = vshll.u32 %v1822_v44, %v399_v31 }
 0x142   : > { %v411_v47 = vshll.u32 %v1823_v46, %v399_v31  ;;  %v414_v49 = vshll.u32 %v1824_v48, %v399_v31  ;;  %vm417_vm3 = vcmp.lt.s32.totalorder %v398_v30, 1  ;;  %vm418_vm4 = vcmp.lt.s32.totalorder %v398_v30, 2 }
 0x143   : > { %v403_v50 = vshrl.u32 %v1821_v42, %v400_v37  ;;  %v406_v51 = vshrl.u32 %v1822_v44, %v400_v37  ;;  %v409_v52 = vshrl.u32 %v1823_v46, %v400_v37  ;;  %v401_v53 = vshrl.u32 %v1820_v38, %v400_v37 }
 0x144   : > { %v412_v54 = vshrl.u32 %v1824_v48, %v400_v37  ;;  %v415_v56 = vshrl.u32 %v1825_v55, %v400_v37  ;;  %v296_v60 = vsub.s32 32, %v295_v40  ;;  %vm419_vm5 = vcmp.lt.s32.totalorder %v398_v30, 3 }
 0x145   : > { %v404_v57 = vor.u32 %v403_v50, %v402_v39  ;;  %v407_v58 = vor.u32 %v406_v51, %v405_v43  ;;  %v410_v59 = vor.u32 %v409_v52, %v408_v45  ;;  %vm420_vm6 = vcmp.lt.s32.totalorder %v398_v30, 4 }
 0x146   : > { %v413_v61 = vor.u32 %v412_v54, %v411_v47  ;;  %v416_v62 = vor.u32 %v415_v56, %v414_v49  ;;  %v298_v10 = vshll.u32 %v1820_v38, %v295_v40  ;;  %v299_v15 = vshrl.u32 %v1821_v42, %v296_v60 }
 0x147   : > { %v421_v63 = vsel %vm417_vm3, %v401_v53, %v404_v57  ;;  %v422_v0 = vsel %vm420_vm6, %v410_v59, 2102212464  ;;  %v425_v2 = vsel %vm417_vm3, %v404_v57, %v407_v58  ;;  %v429_v3 = vsel %vm417_vm3, %v407_v58, %v410_v59 }
 0x148   : > { %v423_v5 = vsel %vm419_vm5, %v407_v58, %v422_v0  ;;  %v426_v6 = vsel %vm420_vm6, %v413_v61, 920167782  ;;  %v430_v7 = vsel %vm420_vm6, %v416_v62, 1326507024  ;;  %v301_v16 = vshll.u32 %v1821_v42, %v295_v40 }
 0x149   : > { %v427_v13 = vsel %vm419_vm5, %v410_v59, %v426_v6  ;;  %v431_v14 = vsel %vm419_vm5, %v413_v61, %v430_v7  ;;  %v424_v17 = vsel %vm418_vm4, %v421_v63, %v423_v5  ;;  %v302_v22 = vshrl.u32 %v1822_v44, %v296_v60 }
 0x14a   : > { %v428_v19 = vsel %vm418_vm4, %v425_v2, %v427_v13  ;;  %v432_v21 = vsel %vm418_vm4, %v429_v3, %v431_v14  ;;  %v300_v27 = vor.u32 %v299_v15, %v298_v10  ;;  %v304_v29 = vshll.u32 %v1822_v44, %v295_v40  ;;  %v701_v13 = vld [vmem:[#allocation6 + $0x20] sm:$0xff] }
 0x14b   : > { %v2045_v23 = vmul.u32.u64.low %v2014_v33, %v432_v21  ;;  %v2046_v24 = vmul.u32.u64.high %v2014_v33, %v432_v21, %v2045_v23  ;;  %v2049_v25 = vmul.u32.u64.low %v2014_v33, %v428_v19  ;;  %v2050_v26 = vmul.u32.u64.high %v2014_v33, %v428_v19, %v2049_v25  ;;  %1504 = vmatprep.mubr.msk.f32.mxu1 %vm710_vm13, %v701_v13 }
 0x14c   : > { %v303_v28 = vor.u32 %v302_v22, %v301_v16  ;;  %v305_v31 = vshrl.u32 %v1823_v46, %v296_v60  ;;  %v297_v30 = vshrl.u32 %v1820_v38, %v296_v60  ;;  %v307_v32 = vshll.u32 %v1823_v46, %v295_v40 }
 0x14d   : > { %v308_v37 = vshrl.u32 %v1824_v48, %v296_v60  ;;  %v311_v39 = vshrl.u32 %v1825_v55, %v296_v60  ;;  %v440_v43 = vmul.u32 %v2014_v33, %v424_v17  ;;  %v310_v47 = vshll.u32 %v1824_v48, %v295_v40 }
 0x14e   : > { %v306_v45 = vor.u32 %v305_v31, %v304_v29  ;;  %vm313_vm7 = vcmp.lt.s32.totalorder %v2016_v34, 1  ;;  %vm442_vm8 = vc.u32 %v2046_v24, %v2049_v25  ;;  %v443_v49 = vadd.s32 1, %v2050_v26 }
 0x14f   : > { %v309_v50 = vor.u32 %v308_v37, %v307_v32  ;;  %vm314_vm9 = vcmp.lt.s32.totalorder %v2016_v34, 2  ;;  %v312_v51 = vor.u32 %v311_v39, %v310_v47  ;;  %vm315_vm10 = vcmp.lt.s32.totalorder %v2016_v34, 3 }
 0x150   : > { %vm316_vm11 = vcmp.lt.s32.totalorder %v2016_v34, 4  ;;  %v321_v52 = vsel %vm313_vm7, %v300_v27, %v303_v28  ;;  %v444_v33 = vsel %vm442_vm8, %v443_v49, %v2050_v26  ;;  %v325_v54 = vsel %vm313_vm7, %v303_v28, %v306_v45 }
 0x151   : > { %v318_v53 = vsel %vm316_vm11, %v306_v45, 2102212464  ;;  %v322_v40 = vsel %vm316_vm11, %v309_v50, 920167782  ;;  %v445_v56 = vadd.s32 %v444_v33, %v440_v43  ;;  %v317_v57 = vsel %vm313_vm7, %v297_v30, %v300_v27 }
 0x152   : > { %v323_v58 = vsel %vm315_vm10, %v306_v45, %v322_v40  ;;  %v326_v59 = vsel %vm316_vm11, %v312_v51, 1326507024  ;;  %v319_v60 = vsel %vm315_vm10, %v303_v28, %v318_v53  ;;  %vm604_vm12 = vcmp.gt.s32.totalorder %v2022_v41, 0 }
 0x153   : > { %v324_v61 = vsel %vm314_vm9, %v321_v52, %v323_v58  ;;  %v327_v62 = vsel %vm315_vm10, %v309_v50, %v326_v59  ;;  %v446_v63 = vadd.s32 536870912, %v445_v56  ;;  %v600_v7 = vand.u32 8388607, %v593_v36 }
 0x154   : > { %v328_v0 = vsel %vm314_vm9, %v325_v54, %v327_v62  ;;  %v2075_v2 = vmul.u32.u64.low %v2018_v35, %v324_v61  ;;  %v2076_v3 = vmul.u32.u64.high %v2018_v35, %v324_v61, %v2075_v2  ;;  %v605_v10 = vsel %vm604_vm12, %v2022_v41, 0 }
 0x155   : > { %v2080_v5 = vmul.u32.u64.low %v2018_v35, %v328_v0  ;;  %v2081_v6 = vmul.u32.u64.high %v2018_v35, %v328_v0, %v2080_v5  ;;  %v2086_v14 = vshrl.u32 %v446_v63, 30  ;;  %v320_v15 = vsel %vm314_vm9, %v317_v57, %v319_v60 }
 0x156   : > { %v607_v16 = vand.u32 31, %v605_v10  ;;  %v339_v19 = vadd.s32 1, %v2076_v3  ;;  %v1826_v21 = vmov 0.0|0.0   ;;  %v336_v22 = vmul.u32 %v2018_v35, %v320_v15 }
 0x157   : > { %v448_v17 = vshll.u32 %v2086_v14, 30  ;;  %1539 = vmatprep.subr.bf16.mxu0 %v1826_v21  ;;  %vm338_vm14 = vc.u32 %v2081_v6, %v2075_v2  ;;  %v601_v41 = vor.u32 8388608, %v600_v7  ;;  %v492_v27 = vand.u32 2139095040, %v2011_v20 }
 0x158   : > { %v608_v23 = vsub.s32 32, %v607_v16  ;;  %v340_v26 = vsel %vm338_vm14, %v339_v19, %v2076_v3  ;;  %v489_v31 = vand.u32 2147483647, %v2011_v20  ;;  %v606_v50 = vshrl.u32 %v605_v10, 5 }
 0x159   : > { %v449_v34 = vsub.s32 %v445_v56, %v448_v17  ;;  %v341_v28 = vadd.s32 %v340_v26, %v336_v22  ;;  %v2102_v35 = vshll.u32 %v601_v41, 8  ;;  %v493_v47 = vshrl.u32 %v492_v27, 23 }
 0x15a   : > { %v611_v32 = vshrl.u32 %v1821_v42, %v608_v23  ;;  %v614_v37 = vshrl.u32 %v1822_v44, %v608_v23  ;;  %v617_v43 = vshrl.u32 %v1823_v46, %v608_v23  ;;  %v620_v45 = vshrl.u32 %v1824_v48, %v608_v23 }
 0x15b   : > { %v451_v29 = vsub.s32 0, %v449_v34  ;;  %v342_v30 = vadd.s32 536870912, %v341_v28  ;;  %v610_v51 = vshll.u32 %v1820_v38, %v607_v16  ;;  %v613_v52 = vshll.u32 %v1821_v42, %v607_v16 }
 0x15c   : > { %v616_v53 = vshll.u32 %v1822_v44, %v607_v16  ;;  %v619_v40 = vshll.u32 %v1823_v46, %v607_v16  ;;  %v623_v54 = vshrl.u32 %v1825_v55, %v608_v23  ;;  %v441_v56 = vadd.s32 %v2049_v25, %v2046_v24 }
 0x15d   : > { %v1426_v39 = vmin.u32 %v451_v29, %v449_v34  ;;  %v2106_v49 = vshrl.u32 %v342_v30, 30  ;;  %v612_v58 = vor.u32 %v611_v32, %v610_v51  ;;  %v615_v59 = vor.u32 %v614_v37, %v613_v52 }
 0x15e   : > { %v618_v61 = vor.u32 %v617_v43, %v616_v53  ;;  %v621_v62 = vor.u32 %v620_v45, %v619_v40  ;;  %v622_v63 = vshll.u32 %v1824_v48, %v607_v16  ;;  %v471_v0 = vsub.s32 4, %v2086_v14 }
 0x15f   : > { %v453_v33 = vclz %v1426_v39  ;;  %v344_v57 = vshll.u32 %v2106_v49, 30  ;;  %v609_v5 = vshrl.u32 %v1820_v38, %v608_v23  ;;  %vm625_vm0 = vcmp.lt.s32.totalorder %v606_v50, 1 }
 0x160   : > { %v624_v25 = vor.u32 %v623_v54, %v622_v63  ;;  %vm626_vm3 = vcmp.lt.s32.totalorder %v606_v50, 2  ;;  %vm627_vm4 = vcmp.lt.s32.totalorder %v606_v50, 3  ;;  %vm628_vm5 = vcmp.lt.s32.totalorder %v606_v50, 4 }
 0x161   : > { %v1427_v60 = vadd.s32 4294967294, %v453_v33  ;;  %v2119_v3 = vsub.s32 %v341_v28, %v344_v57  ;;  %v633_v13 = vsel %vm625_vm0, %v612_v58, %v615_v59  ;;  %v630_v17 = vsel %vm628_vm5, %v618_v61, 2102212464 }
 0x162   : > { %v634_v19 = vsel %vm628_vm5, %v621_v62, 920167782  ;;  %v637_v23 = vsel %vm625_vm0, %v615_v59, %v618_v61  ;;  %v638_v29 = vsel %vm628_vm5, %v624_v25, 1326507024  ;;  %vm283_vm6 = vcmp.lt.s32.totalorder %v2001_v11, 0 }
 0x163   : > { %vm1428_vm2 = vcmp.lt.s32.totalorder %v1427_v60, 0  ;;  %v347_v10 = vsub.s32 0, %v2119_v3  ;;  %v635_v41 = vsel %vm627_vm4, %v618_v61, %v634_v19  ;;  %v629_v32 = vsel %vm625_vm0, %v609_v5, %v612_v58 }
 0x164   : > { %v456_v7 = vsel %vm1428_vm2, 0, %v1427_v60  ;;  %v636_v28 = vsel %vm626_vm3, %v633_v13, %v635_v41  ;;  %v631_v37 = vsel %vm627_vm4, %v615_v59, %v630_v17  ;;  %v1429_v39 = vadd.s32 4294967169, %v493_v47 }
 0x165   : > { %v457_v15 = vsub.s32 32, %v456_v7  ;;  %v461_v16 = vsub.s32 4294967266, %v456_v7  ;;  %v458_v22 = vshll.u32 %v449_v34, %v456_v7  ;;  %v1422_v9 = vmin.u32 %v347_v10, %v2119_v3 }
 0x166   : > { %v472_v45 = vsel %vm387_vm15, %v471_v0, %v2086_v14  ;;  %v639_v51 = vsel %vm627_vm4, %v621_v62, %v638_v29  ;;  %v2143_v53 = vmul.u32.u64.low %v2102_v35, %v636_v28  ;;  %v2144_v40 = vmul.u32.u64.high %v2102_v35, %v636_v28, %v2143_v53 }
 0x167   : > { %v459_v26 = vshrl.u32 %v441_v56, %v457_v15  ;;  %v462_v27 = vadd.s32 127, %v461_v16  ;;  %v349_v30 = vclz %v1422_v9  ;;  %v640_v33 = vsel %vm626_vm3, %v637_v23, %v639_v51 }
 0x168   : > { %v632_v56 = vsel %vm626_vm3, %v629_v32, %v631_v37  ;;  %v2149_v47 = vmul.u32.u64.low %v2102_v35, %v640_v33  ;;  %v2150_v57 = vmul.u32.u64.high %v2102_v35, %v640_v33, %v2149_v47  ;;  %v474_v14 = vsel %vm2124_vm1, 0, %v472_v45 }
 0x169   : > { %v460_v34 = vor.u32 %v459_v26, %v458_v22  ;;  %v463_v43 = vshll.u32 %v462_v27, 23  ;;  %v1423_v52 = vadd.s32 4294967294, %v349_v30  ;;  %v337_v58 = vadd.s32 %v2075_v2, %v2081_v6 }
 0x16a   : > { %v499_v59 = vadd.s32 1, %v1429_v39  ;;  %v367_v63 = vsub.s32 4, %v2106_v49  ;;  %v648_v5 = vmul.u32 %v2102_v35, %v632_v56  ;;  %v651_v25 = vadd.s32 1, %v2144_v40 }
 0x16b   : > { %v464_v54 = vor.u32 4788187, %v463_v43  ;;  %vm1424_vm7 = vcmp.lt.s32.totalorder %v1423_v52, 0  ;;  %v467_v61 = vcvt.s32.f32 %v460_v34  ;;  %vm650_vm8 = vc.u32 %v2150_v57, %v2143_v53 }
 0x16c   : > { %v352_v62 = vsel %vm1424_vm7, 0, %v1423_v52  ;;  %vm500_vm9 = vcmp.gt.s32.totalorder %v499_v59, 0  ;;  %v652_v13 = vsel %vm650_vm8, %v651_v25, %v2144_v40  ;;  %v368_v17 = vsel %vm283_vm6, %v367_v63, %v2106_v49 }
 0x16d   : > { %v465_v60 = vand.u32 2147483647, %v464_v54  ;;  %v353_v0 = vsub.s32 32, %v352_v62  ;;  %v357_v50 = vsub.s32 4294967266, %v352_v62  ;;  %v354_v10 = vshll.u32 %v2119_v3, %v352_v62 }
 0x16e   : > { %v501_v15 = vsel %vm500_vm9, %v499_v59, 0  ;;  %v653_v35 = vadd.s32 %v652_v13, %v648_v5  ;;  %v478_v22 = vadd.s32 3, %v474_v14  ;;  %vm2170_vm10 = vcmp.le.f32.partialorder %v281_v12, 0.7853982 }
 0x16f   : > { %v468_v7 = vmul.f32 %v467_v61, %v465_v60  ;;  %v355_v2 = vshrl.u32 %v337_v58, %v353_v0  ;;  %v358_v6 = vadd.s32 127, %v357_v50  ;;  %v503_v19 = vand.u32 31, %v501_v15 }
 0x170   : > { %v654_v26 = vadd.s32 536870912, %v653_v35  ;;  %v370_v29 = vsel %vm2170_vm10, 0, %v368_v17  ;;  %v496_v32 = vand.u32 8388607, %v489_v31  ;;  %v479_v12 = vand.u32 3, %v478_v22 }
 0x171   : > { %v469_v16 = vxor.u32 2147483648, %v468_v7  ;;  %v356_v9 = vor.u32 %v355_v2, %v354_v10  ;;  %v359_v41 = vshll.u32 %v358_v6, 23  ;;  %v504_v27 = vsub.s32 32, %v503_v19 }
 0x172   : > { %v2179_v30 = vshrl.u32 %v654_v26, 30  ;;  %v374_v34 = vadd.s32 3, %v370_v29  ;;  %v515_v33 = vshll.u32 %v1823_v46, %v503_v19  ;;  %v2191_v56 = vshrl.u32 %v501_v15, 5 }
 0x173   : > { %v470_v3 = vsel %vm387_vm15, %v469_v16, %v468_v7  ;;  %v360_v28 = vor.u32 4788187, %v359_v41  ;;  %v363_v39 = vcvt.s32.f32 %v356_v9  ;;  %v507_v24 = vshrl.u32 %v1821_v42, %v504_v27 }
 0x174   : > { %v473_v49 = vsel %vm2124_vm1, %v1997_v8, %v470_v3  ;;  %v656_v43 = vshll.u32 %v2179_v30, 30  ;;  %v510_v45 = vshrl.u32 %v1822_v44, %v504_v27  ;;  %v513_v52 = vshrl.u32 %v1823_v46, %v504_v27 }
 0x175   : > { %1652 = vcosq.f32 %v473_v49  ;;  %v361_v37 = vand.u32 2147483647, %v360_v28  ;;  %v516_v40 = vshrl.u32 %v1824_v48, %v504_v27  ;;  %v506_v47 = vshll.u32 %v1820_v38, %v503_v19 }
 0x176   : > { %1654 = vsinq.f32 %v473_v49  ;;  %v2189_v54 = vsub.s32 %v653_v35, %v656_v43  ;;  %v509_v14 = vshll.u32 %v1821_v42, %v503_v19  ;;  %vm481_vm11 = vcmp.eq.s32.totalorder %v479_v12, 0 }
 0x177   : > { %v364_v51 = vmul.f32 %v363_v39, %v361_v37  ;;  %v512_v59 = vshll.u32 %v1822_v44, %v503_v19  ;;  %v517_v60 = vor.u32 %v516_v40, %v515_v33  ;;  %v519_v61 = vshrl.u32 %v1825_v55, %v504_v27 }
 0x178   : > { %vm480_vm12 = vcmp.lt.s32.totalorder %v479_v12, 2  ;;  %vm484_vm14 = vcmp.eq.s32.totalorder %v479_v12, 2  ;;  %v659_v62 = vsub.s32 0, %v2189_v54  ;;  %v497_v63 = vor.u32 8388608, %v496_v32 }
 0x179   : > { %v365_v58 = vxor.u32 2147483648, %v364_v51  ;;  %v508_v0 = vor.u32 %v507_v24, %v506_v47  ;;  %vm477_vm15 = vweird.f32 %v1997_v8  ;;  %v511_v5 = vor.u32 %v510_v45, %v509_v14 }
 0x17a   : > { %v514_v25 = vor.u32 %v513_v52, %v512_v59  ;;  %v518_v7 = vshll.u32 %v1824_v48, %v503_v19  ;;  %v2205_v2 = vand.u32 3, %v374_v34  ;;  %v1434_v6 = vmin.u32 %v659_v62, %v2189_v54 }
 0x17b   : > { %v366_v50 = vsel %vm283_vm6, %v365_v58, %v364_v51  ;;  %vm524_vm0 = vcmp.lt.s32.totalorder %v2191_v56, 4  ;;  %v649_v13 = vadd.s32 %v2143_v53, %v2150_v57  ;;  %vm521_vm1 = vcmp.lt.s32.totalorder %v2191_v56, 1 }
 0x17c   : > { %v369_v10 = vsel %vm2170_vm10, %v2001_v11, %v366_v50  ;;  %v520_v15 = vor.u32 %v519_v61, %v518_v7  ;;  %v530_v16 = vsel %vm524_vm0, %v517_v60, 920167782  ;;  %v661_v35 = vclz %v1434_v6 }
 0x17d   : > { %1656 = vcosq.f32 %v369_v10  ;;  %vm523_vm2 = vcmp.lt.s32.totalorder %v2191_v56, 3  ;;  %v529_v9 = vsel %vm521_vm1, %v508_v0, %v511_v5  ;;  %v537_v53 = vshll.u32 %v497_v63, 8 }
 0x17e   : > { %1658 = vsinq.f32 %v369_v10  ;;  %v531_v41 = vsel %vm523_vm2, %v514_v25, %v530_v16  ;;  %v1435_v3 = vadd.s32 4294967294, %v661_v35  ;;  %v505_v23 = vshrl.u32 %v1820_v38, %v504_v27 }
 0x17f   : > { %v1653_v17 = vpop.eup %1652  ;;  %vm522_vm3 = vcmp.lt.s32.totalorder %v2191_v56, 2  ;;  %v526_v49 = vsel %vm524_vm0, %v514_v25, 2102212464  ;;  %v533_v28 = vsel %vm521_vm1, %v511_v5, %v514_v25  ;;  %v534_v29 = vsel %vm524_vm0, %v520_v15, 1326507024 }
 0x180   : > { %v1655_v19 = vpop.eup %1654  ;;  %v485_v22 = vxor.u32 2147483648, %v1653_v17  ;;  %vm1436_vm4 = vcmp.lt.s32.totalorder %v1435_v3, 0  ;;  %v532_v37 = vsel %vm522_vm3, %v529_v9, %v531_v41  ;;  %v535_v27 = vsel %vm523_vm2, %v517_v60, %v534_v29 }
 0x181   : > { %v482_v57 = vxor.u32 2147483648, %v1655_v19  ;;  %v664_v34 = vsel %vm1436_vm4, 0, %v1435_v3  ;;  %v525_v43 = vsel %vm521_vm1, %v505_v23, %v508_v0  ;;  %v536_v24 = vsel %vm522_vm3, %v533_v28, %v535_v27 }
 0x182   : > { %v486_v26 = vsel %vm484_vm14, %v485_v22, %v1655_v19  ;;  %v665_v51 = vsub.s32 32, %v664_v34  ;;  %v669_v52 = vsub.s32 4294967266, %v664_v34  ;;  %v527_v33 = vsel %vm523_vm2, %v511_v5, %v526_v49 }
 0x183   : > { %v483_v32 = vsel %vm481_vm11, %v1653_v17, %v482_v57  ;;  %v2244_v40 = vmul.u32.u64.low %v537_v53, %v536_v24  ;;  %v2245_v47 = vmul.u32.u64.high %v537_v53, %v536_v24, %v2244_v40  ;;  %v666_v58 = vshll.u32 %v2189_v54, %v664_v34 }
 0x184   : > { %v487_v39 = vsel %vm480_vm12, %v483_v32, %v486_v26  ;;  %v2247_v12 = vmul.u32.u64.low %v537_v53, %v532_v37  ;;  %v2248_v14 = vmul.u32.u64.high %v537_v53, %v532_v37, %v2247_v12  ;;  %v667_v59 = vshrl.u32 %v649_v13, %v665_v51 }
 0x185   : > { %v2240_v45 = vsel %vm477_vm15, nan, %v487_v39  ;;  %v670_v60 = vadd.s32 127, %v669_v52  ;;  %v528_v8 = vsel %vm522_vm3, %v525_v43, %v527_v33  ;;  %vm380_vm5 = vcmp.eq.s32.totalorder %v2205_v2, 2 }
 0x186   : > { %v668_v0 = vor.u32 %v667_v59, %v666_v58  ;;  %vm546_vm6 = vc.u32 %v2245_v47, %v2247_v12  ;;  %v547_v5 = vadd.s32 1, %v2248_v14  ;;  %vm377_vm7 = vcmp.eq.s32.totalorder %v2205_v2, 0 }
 0x187   : > { %v1657_v61 = vpop.eup %1656  ;;  %v671_v50 = vshll.u32 %v670_v60, 23  ;;  %v544_v10 = vmul.u32 %v537_v53, %v528_v8  ;;  %vm373_vm8 = vweird.f32 %v2001_v11  ;;  %vm376_vm9 = vcmp.lt.s32.totalorder %v2205_v2, 2 }
 0x188   : > { %v1659_v62 = vpop.eup %1658  ;;  %v381_v63 = vxor.u32 2147483648, %v1657_v61  ;;  %v548_v6 = vsel %vm546_vm6, %v547_v5, %v2248_v14  ;;  %v675_v16 = vcvt.s32.f32 %v668_v0  ;;  %v679_v19 = vsub.s32 4, %v2179_v30 }
 0x189   : > { %v378_v25 = vxor.u32 2147483648, %v1659_v62  ;;  %v672_v7 = vor.u32 4788187, %v671_v50  ;;  %v549_v17 = vadd.s32 %v548_v6, %v544_v10  ;;  %vm595_vm10 = vcmp.lt.s32.totalorder %v2009_v18, 0 }
 0x18a   : > { %v382_v54 = vsel %vm380_vm5, %v381_v63, %v1659_v62  ;;  %v680_v2 = vsel %vm595_vm10, %v679_v19, %v2179_v30  ;;  %vm594_vm11 = vcmp.le.f32.partialorder %v593_v36, 0.7853982  ;;  %v545_v24 = vadd.s32 %v2247_v12, %v2245_v47 }
 0x18b   : > { %v379_v56 = vsel %vm377_vm7, %v1657_v61, %v378_v25  ;;  %v673_v15 = vand.u32 2147483647, %v672_v7  ;;  %v550_v9 = vadd.s32 536870912, %v549_v17  ;;  %v682_v26 = vsel %vm594_vm11, 0, %v680_v2 }
 0x18c   : > { %v383_v13 = vsel %vm376_vm9, %v379_v56, %v382_v54  ;;  %v686_v28 = vadd.s32 3, %v682_v26  ;;  %vm685_vm1 = vweird.f32 %v2009_v18  ;;  %vm491_vm2 = vcmp.lt.s32.totalorder %v2011_v20, 0 }
 0x18d   : > { %v384_v35 = vsel %vm373_vm8, nan, %v383_v13  ;;  %v676_v22 = vmul.f32 %v675_v16, %v673_v15  ;;  %v551_v11 = vshrl.u32 %v550_v9, 30  ;;  %vm490_vm3 = vcmp.le.f32.partialorder %v489_v31, 0.7853982  ;;  %v702_v9 = vld [vmem:[#allocation6 + $0x28] sm:$0xff] }
 0x18e   : > { %v1531_v41 = vpack.c.bf16 %v384_v35, %v1993_v4  ;;  %v687_v37 = vand.u32 3, %v686_v28  ;;  %vm581_vm7 = vweird.f32 %v2011_v20 }
 0x18f   : > { %v677_v53 = vxor.u32 2147483648, %v676_v22  ;;  %v552_v3 = vshll.u32 %v551_v11, 30  ;;  %v575_v12 = vsub.s32 4, %v551_v11 }
 0x190   : > { %1532 = vmatprep.subr.bf16.mxu1 %v1531_v41  ;;  %1541 = vmatpush3.bf16.msra.mxu0 %v1531_v41  ;;  %vm692_vm14 = vcmp.eq.s32.totalorder %v687_v37, 2  ;;  %vm688_vm15 = vcmp.lt.s32.totalorder %v687_v37, 2  ;;  %vm689_vm0 = vcmp.eq.s32.totalorder %v687_v37, 0 }
 0x191   : > { %1534 = vmatpush3.bf16.msra.mxu1 %v1531_v41  ;;  %1542 = vmatprep.subr.bf16.mxu0 %v1826_v21  ;;  %v678_v57 = vsel %vm595_vm10, %v677_v53, %v676_v22  ;;  %v553_v4 = vsub.s32 %v549_v17, %v552_v3  ;;  %v576_v54 = vsel %vm491_vm2, %v575_v12, %v551_v11  ;;  %v703_v41 = vld [vmem:[#allocation6 + $0x30] sm:$0xff]  ;;  %v704_v53 = vld [vmem:[#allocation6 + $0x38] sm:$0xff] }
 0x192   : > { %v681_v23 = vsel %vm594_vm11, %v2009_v18, %v678_v57  ;;  %v578_v7 = vsel %vm490_vm3, 0, %v576_v54 }
 0x193   : > { %1660 = vcosq.f32 %v681_v23  ;;  %v555_v49 = vsub.s32 0, %v553_v4  ;;  %v582_v10 = vadd.s32 3, %v578_v7 }
 0x194   : > { %1662 = vsinq.f32 %v681_v23 }
 0x195   : > { %v1430_v29 = vmin.u32 %v555_v49, %v553_v4  ;;  %v583_v56 = vand.u32 3, %v582_v10 }
 0x197   : > { %v557_v32 = vclz %v1430_v29  ;;  %vm588_vm4 = vcmp.eq.s32.totalorder %v583_v56, 2  ;;  %vm585_vm5 = vcmp.eq.s32.totalorder %v583_v56, 0  ;;  %vm584_vm6 = vcmp.lt.s32.totalorder %v583_v56, 2 }
 0x199   : > { %v1431_v30 = vadd.s32 4294967294, %v557_v32 }
 0x19b   : > { %vm1432_vm12 = vcmp.lt.s32.totalorder %v1431_v30, 0 }
 0x19c   : > { %v560_v36 = vsel %vm1432_vm12, 0, %v1431_v30 }
 0x19d   : > { %v1661_v27 = vpop.eup %1660  ;;  %v561_v51 = vsub.s32 32, %v560_v36  ;;  %v565_v52 = vsub.s32 4294967266, %v560_v36  ;;  %v562_v14 = vshll.u32 %v553_v4, %v560_v36 }
 0x19e   : > { %v1663_v39 = vpop.eup %1662  ;;  %v693_v34 = vxor.u32 2147483648, %v1661_v27 }
 0x19f   : > { %v690_v43 = vxor.u32 2147483648, %v1663_v39  ;;  %v563_v58 = vshrl.u32 %v545_v24, %v561_v51  ;;  %v566_v59 = vadd.s32 127, %v565_v52 }
 0x1a0   : > { %v694_v33 = vsel %vm692_vm14, %v693_v34, %v1663_v39 }
 0x1a1   : > { %v691_v40 = vsel %vm689_vm0, %v1661_v27, %v690_v43  ;;  %v564_v8 = vor.u32 %v563_v58, %v562_v14  ;;  %v567_v62 = vshll.u32 %v566_v59, 23 }
 0x1a2   : > { %v695_v60 = vsel %vm688_vm15, %v691_v40, %v694_v33 }
 0x1a3   : > { %v696_v61 = vsel %vm685_vm1, nan, %v695_v60  ;;  %v568_v63 = vor.u32 4788187, %v567_v62  ;;  %v571_v50 = vcvt.s32.f32 %v564_v8 }
 0x1a4   : > { %700 = vst [vmem:[#allocation2 + $0x20] sm:$0xff] %v696_v61 }
 0x1a5   : > { %v569_v0 = vand.u32 2147483647, %v568_v63 }
 0x1a7   : > { %v572_v47 = vmul.f32 %v571_v50, %v569_v0 }
 0x1a9   : > { %v573_v25 = vxor.u32 2147483648, %v572_v47 }
 0x1ab   : > { %v574_v5 = vsel %vm491_vm2, %v573_v25, %v572_v47 }
 0x1ac   : > { %v577_v18 = vsel %vm490_vm3, %v2011_v20, %v574_v5 }
 0x1ad   : > { %1664 = vcosq.f32 %v577_v18 }
 0x1ae   : > { %1666 = vsinq.f32 %v577_v18 }
 0x1b7   : > { %v1665_v6 = vpop.eup %1664 }
 0x1b8   : > { %v1667_v13 = vpop.eup %1666  ;;  %v589_v15 = vxor.u32 2147483648, %v1665_v6 }
 0x1b9   : > { %v586_v16 = vxor.u32 2147483648, %v1667_v13 }
 0x1ba   : > { %v590_v17 = vsel %vm588_vm4, %v589_v15, %v1667_v13  ;;  %vm1827_vm4 = vmmov 0  }
 0x1bb   : > { %v587_v35 = vsel %vm585_vm5, %v1665_v6, %v586_v16  ;;  %1528 = vmatprep.mubr.msk.f32.mxu0 %vm1827_vm4, %v1819_v1 }
 0x1bc   : > { %v591_v31 = vsel %vm584_vm6, %v587_v35, %v590_v17 }
 0x1bd   : > { %v592_v19 = vsel %vm581_vm7, nan, %v591_v31 }
 0x1be   : > { %v1535_v22 = vpack.c.bf16 %v592_v19, %v2240_v45 }
 0x1c0   : > { %1536 = vmatprep.subr.bf16.mxu1 %v1535_v22  ;;  %1544 = vmatpush3.bf16.msra.mxu0 %v1535_v22 }
 0x1c1   : > { %1538 = vmatpush3.bf16.msra.mxu1 %v1535_v22  ;;  %1545 = vmatprep.subr.bf16.mxu0 %v1826_v21 }
 0x1c2   : > { %1502 = vmatprep.subr.mxu1 %v696_v61 }
 0x1c5   : > { %1503 = vmatpush3.msra.mxu1 %v696_v61 }
 0x1c6   : > { %1505 = vmatmul.mubr.msk.f32.vlgmr.msra.gmra.mrb[4].mxu1 %vm710_vm13, %v702_v9 }
 0x1c7   : > { %1507 = vmatprep.mubr.msk.f32.mxu1 %vm710_vm13, %v703_v41 }
 0x1ca   : > { %1508 = vmatmul.mubr.msk.f32.gmra.mrb[6].mxu1 %vm710_vm13, %v704_v53 }
 0x299   : > { %v2280_v20 = vpop.f32.mrb[4].mxu1 }
 0x29a   : > { %v912_v45 = vand.u32 2147483647, %v2280_v20  ;;  %v915_v11 = vand.u32 2139095040, %v2280_v20  ;;  %v2284_v2 = vpop.f32.mrb[5].mxu1  ;;  %vm914_vm6 = vcmp.lt.s32.totalorder %v2280_v20, 0 }
 0x29b   : > { %v808_v57 = vand.u32 2147483647, %v2284_v2  ;;  %v811_v3 = vand.u32 2139095040, %v2284_v2 }
 0x29c   : > { %v916_v23 = vshrl.u32 %v915_v11, 23  ;;  %v919_v26 = vand.u32 8388607, %v912_v45 }
 0x29d   : > { %v812_v4 = vshrl.u32 %v811_v3, 23  ;;  %v815_v49 = vand.u32 8388607, %v808_v57  ;;  %v2292_v28 = vpop.f32.mrb[6].mxu1 }
 0x29e   : > { %v1445_v29 = vadd.s32 4294967169, %v916_v23  ;;  %v2294_v32 = vpop.f32.mrb[7].mxu1  ;;  %v1123_v30 = vand.u32 2139095040, %v2292_v28  ;;  %v920_v39 = vor.u32 8388608, %v919_v26  ;;  %v1120_v60 = vand.u32 2147483647, %v2292_v28 }
 0x29f   : > { %v1441_v37 = vadd.s32 4294967169, %v812_v4  ;;  %v816_v34 = vor.u32 8388608, %v815_v49 }
 0x2a0   : > { %v922_v27 = vadd.s32 1, %v1445_v29  ;;  %v1124_v43 = vshrl.u32 %v1123_v30, 23  ;;  %v2297_v14 = vshll.u32 %v920_v39, 8 }
 0x2a1   : > { %v818_v36 = vadd.s32 1, %v1441_v37  ;;  %v2301_v59 = vshll.u32 %v816_v34, 8 }
 0x2a2   : > { %vm923_vm13 = vcmp.gt.s32.totalorder %v922_v27, 0  ;;  %v1453_v51 = vadd.s32 4294967169, %v1124_v43 }
 0x2a3   : > { %v924_v24 = vsel %vm923_vm13, %v922_v27, 0  ;;  %vm819_vm8 = vcmp.gt.s32.totalorder %v818_v36, 0  ;;  %vm2406_vm13 = vcmp.le.f32.partialorder %v912_v45, 0.7853982 }
 0x2a4   : > { %v925_v52 = vshrl.u32 %v924_v24, 5  ;;  %v926_v33 = vand.u32 31, %v924_v24  ;;  %v820_v40 = vsel %vm819_vm8, %v818_v36, 0  ;;  %v2305_v63 = vadd.s32 1, %v1453_v51 }
 0x2a5   : > { %v2299_v58 = vshrl.u32 %v820_v40, 5  ;;  %v822_v62 = vand.u32 31, %v820_v40 }
 0x2a6   : > { %v927_v61 = vsub.s32 32, %v926_v33  ;;  %v929_v8 = vshll.u32 %v1820_v38, %v926_v33  ;;  %v932_v0 = vshll.u32 %v1821_v42, %v926_v33  ;;  %v935_v50 = vshll.u32 %v1822_v44, %v926_v33 }
 0x2a7   : > { %v938_v47 = vshll.u32 %v1823_v46, %v926_v33  ;;  %v941_v12 = vshll.u32 %v1824_v48, %v926_v33  ;;  %vm944_vm9 = vcmp.lt.s32.totalorder %v925_v52, 1  ;;  %vm945_vm10 = vcmp.lt.s32.totalorder %v925_v52, 2 }
 0x2a8   : > { %v930_v25 = vshrl.u32 %v1821_v42, %v927_v61  ;;  %v933_v5 = vshrl.u32 %v1822_v44, %v927_v61  ;;  %v936_v54 = vshrl.u32 %v1823_v46, %v927_v61  ;;  %v928_v18 = vshrl.u32 %v1820_v38, %v927_v61 }
 0x2a9   : > { %v939_v7 = vshrl.u32 %v1824_v48, %v927_v61  ;;  %v942_v10 = vshrl.u32 %v1825_v55, %v927_v61  ;;  %v823_v15 = vsub.s32 32, %v822_v62  ;;  %vm946_vm11 = vcmp.lt.s32.totalorder %v925_v52, 3 }
 0x2aa   : > { %v931_v56 = vor.u32 %v930_v25, %v929_v8  ;;  %v934_v6 = vor.u32 %v933_v5, %v932_v0  ;;  %v937_v13 = vor.u32 %v936_v54, %v935_v50  ;;  %vm947_vm12 = vcmp.lt.s32.totalorder %v925_v52, 4 }
 0x2ab   : > { %v940_v16 = vor.u32 %v939_v7, %v938_v47  ;;  %v943_v17 = vor.u32 %v942_v10, %v941_v12  ;;  %v825_v11 = vshll.u32 %v1820_v38, %v822_v62  ;;  %v826_v26 = vshrl.u32 %v1821_v42, %v823_v15 }
 0x2ac   : > { %v948_v35 = vsel %vm944_vm9, %v928_v18, %v931_v56  ;;  %v949_v31 = vsel %vm947_vm12, %v937_v13, 2102212464  ;;  %v952_v19 = vsel %vm944_vm9, %v931_v56, %v934_v6  ;;  %v956_v22 = vsel %vm944_vm9, %v934_v6, %v937_v13 }
 0x2ad   : > { %v950_v9 = vsel %vm946_vm11, %v934_v6, %v949_v31  ;;  %v953_v41 = vsel %vm947_vm12, %v940_v16, 920167782  ;;  %v957_v53 = vsel %vm947_vm12, %v943_v17, 1326507024  ;;  %v828_v4 = vshll.u32 %v1821_v42, %v822_v62 }
 0x2ae   : > { %v954_v3 = vsel %vm946_vm11, %v937_v13, %v953_v41  ;;  %v958_v23 = vsel %vm946_vm11, %v940_v16, %v957_v53  ;;  %v951_v49 = vsel %vm945_vm10, %v948_v35, %v950_v9  ;;  %v829_v30 = vshrl.u32 %v1822_v44, %v823_v15 }
 0x2af   : > { %v955_v29 = vsel %vm945_vm10, %v952_v19, %v954_v3  ;;  %v959_v37 = vsel %vm945_vm10, %v956_v22, %v958_v23  ;;  %v827_v43 = vor.u32 %v826_v26, %v825_v11  ;;  %v831_v51 = vshll.u32 %v1822_v44, %v822_v62 }
 0x2b0   : > { %v2328_v27 = vmul.u32.u64.low %v2297_v14, %v959_v37  ;;  %v2329_v39 = vmul.u32.u64.high %v2297_v14, %v959_v37, %v2328_v27  ;;  %v2332_v34 = vmul.u32.u64.low %v2297_v14, %v955_v29  ;;  %v2333_v36 = vmul.u32.u64.high %v2297_v14, %v955_v29, %v2332_v34 }
 0x2b1   : > { %v830_v24 = vor.u32 %v829_v30, %v828_v4  ;;  %v832_v33 = vshrl.u32 %v1823_v46, %v823_v15  ;;  %v824_v52 = vshrl.u32 %v1820_v38, %v823_v15  ;;  %v834_v40 = vshll.u32 %v1823_v46, %v822_v62 }
 0x2b2   : > { %v835_v61 = vshrl.u32 %v1824_v48, %v823_v15  ;;  %v838_v8 = vshrl.u32 %v1825_v55, %v823_v15  ;;  %v967_v0 = vmul.u32 %v2297_v14, %v951_v49  ;;  %v837_v47 = vshll.u32 %v1824_v48, %v822_v62 }
 0x2b3   : > { %v833_v50 = vor.u32 %v832_v33, %v831_v51  ;;  %vm840_vm14 = vcmp.lt.s32.totalorder %v2299_v58, 1  ;;  %vm969_vm15 = vc.u32 %v2329_v39, %v2332_v34  ;;  %v970_v12 = vadd.s32 1, %v2333_v36 }
 0x2b4   : > { %v836_v25 = vor.u32 %v835_v61, %v834_v40  ;;  %vm841_vm0 = vcmp.lt.s32.totalorder %v2299_v58, 2  ;;  %v839_v5 = vor.u32 %v838_v8, %v837_v47  ;;  %vm842_vm1 = vcmp.lt.s32.totalorder %v2299_v58, 3 }
 0x2b5   : > { %vm843_vm2 = vcmp.lt.s32.totalorder %v2299_v58, 4  ;;  %v848_v54 = vsel %vm840_vm14, %v827_v43, %v830_v24  ;;  %v971_v14 = vsel %vm969_vm15, %v970_v12, %v2333_v36  ;;  %v852_v7 = vsel %vm840_vm14, %v830_v24, %v833_v50 }
 0x2b6   : > { %v845_v18 = vsel %vm843_vm2, %v833_v50, 2102212464  ;;  %v849_v62 = vsel %vm843_vm2, %v836_v25, 920167782  ;;  %v972_v10 = vadd.s32 %v971_v14, %v967_v0  ;;  %v844_v56 = vsel %vm840_vm14, %v824_v52, %v827_v43 }
 0x2b7   : > { %v850_v6 = vsel %vm842_vm1, %v833_v50, %v849_v62  ;;  %v853_v13 = vsel %vm843_vm2, %v839_v5, 1326507024  ;;  %v846_v15 = vsel %vm842_vm1, %v830_v24, %v845_v18  ;;  %vm1131_vm3 = vcmp.gt.s32.totalorder %v2305_v63, 0 }
 0x2b8   : > { %v851_v16 = vsel %vm841_vm0, %v848_v54, %v850_v6  ;;  %v854_v17 = vsel %vm842_vm1, %v836_v25, %v853_v13  ;;  %v973_v35 = vadd.s32 536870912, %v972_v10  ;;  %v1127_v53 = vand.u32 8388607, %v1120_v60 }
 0x2b9   : > { %v855_v31 = vsel %vm841_vm0, %v852_v7, %v854_v17  ;;  %v2358_v19 = vmul.u32.u64.low %v2301_v59, %v851_v16  ;;  %v2359_v22 = vmul.u32.u64.high %v2301_v59, %v851_v16, %v2358_v19  ;;  %v1132_v11 = vsel %vm1131_vm3, %v2305_v63, 0 }
 0x2ba   : > { %v2363_v9 = vmul.u32.u64.low %v2301_v59, %v855_v31  ;;  %v2364_v41 = vmul.u32.u64.high %v2301_v59, %v855_v31, %v2363_v9  ;;  %v2369_v3 = vshrl.u32 %v973_v35, 30  ;;  %v847_v23 = vsel %vm841_vm0, %v844_v56, %v846_v15 }
 0x2bb   : > { %v1134_v26 = vand.u32 31, %v1132_v11  ;;  %v866_v49 = vadd.s32 1, %v2359_v22  ;;  %v863_v29 = vmul.u32 %v2301_v59, %v847_v23  ;;  %v1128_v37 = vor.u32 8388608, %v1127_v53 }
 0x2bc   : > { %v975_v4 = vshll.u32 %v2369_v3, 30  ;;  %vm865_vm5 = vc.u32 %v2364_v41, %v2358_v19  ;;  %v1019_v58 = vand.u32 2139095040, %v2294_v32  ;;  %v1016_v24 = vand.u32 2147483647, %v2294_v32 }
 0x2bd   : > { %v1135_v63 = vsub.s32 32, %v1134_v26  ;;  %v867_v27 = vsel %vm865_vm5, %v866_v49, %v2359_v22  ;;  %v2384_v59 = vshll.u32 %v1128_v37, 8  ;;  %v1133_v47 = vshrl.u32 %v1132_v11, 5 }
 0x2be   : > { %v976_v30 = vsub.s32 %v972_v10, %v975_v4  ;;  %v868_v36 = vadd.s32 %v867_v27, %v863_v29  ;;  %v1020_v0 = vshrl.u32 %v1019_v58, 23  ;;  %v1137_v12 = vshll.u32 %v1820_v38, %v1134_v26 }
 0x2bf   : > { %v1138_v33 = vshrl.u32 %v1821_v42, %v1135_v63  ;;  %v1141_v52 = vshrl.u32 %v1822_v44, %v1135_v63  ;;  %v1144_v61 = vshrl.u32 %v1823_v46, %v1135_v63  ;;  %v1147_v8 = vshrl.u32 %v1824_v48, %v1135_v63 }
 0x2c0   : > { %v978_v43 = vsub.s32 0, %v976_v30  ;;  %v869_v51 = vadd.s32 536870912, %v868_v36  ;;  %v1140_v25 = vshll.u32 %v1821_v42, %v1134_v26  ;;  %v1143_v54 = vshll.u32 %v1822_v44, %v1134_v26 }
 0x2c1   : > { %v1146_v14 = vshll.u32 %v1823_v46, %v1134_v26  ;;  %v1150_v18 = vshrl.u32 %v1825_v55, %v1135_v63  ;;  %v968_v62 = vadd.s32 %v2332_v34, %v2329_v39  ;;  %v1139_v10 = vor.u32 %v1138_v33, %v1137_v12 }
 0x2c2   : > { %v1446_v40 = vmin.u32 %v978_v43, %v976_v30  ;;  %v2388_v50 = vshrl.u32 %v869_v51, 30  ;;  %v1142_v56 = vor.u32 %v1141_v52, %v1140_v25  ;;  %v1145_v13 = vor.u32 %v1144_v61, %v1143_v54 }
 0x2c3   : > { %v1148_v15 = vor.u32 %v1147_v8, %v1146_v14  ;;  %v1149_v16 = vshll.u32 %v1824_v48, %v1134_v26  ;;  %v998_v17 = vsub.s32 4, %v2369_v3  ;;  %v1136_v31 = vshrl.u32 %v1820_v38, %v1135_v63 }
 0x2c4   : > { %v980_v5 = vclz %v1446_v40  ;;  %v871_v7 = vshll.u32 %v2388_v50, 30  ;;  %vm1152_vm7 = vcmp.lt.s32.totalorder %v1133_v47, 1  ;;  %vm1153_vm9 = vcmp.lt.s32.totalorder %v1133_v47, 2 }
 0x2c5   : > { %v1151_v34 = vor.u32 %v1150_v18, %v1149_v16  ;;  %vm1154_vm10 = vcmp.lt.s32.totalorder %v1133_v47, 3  ;;  %vm1155_vm11 = vcmp.lt.s32.totalorder %v1133_v47, 4  ;;  %v1160_v53 = vsel %vm1152_vm7, %v1139_v10, %v1142_v56 }
 0x2c6   : > { %v1447_v6 = vadd.s32 4294967294, %v980_v5  ;;  %v2401_v35 = vsub.s32 %v868_v36, %v871_v7  ;;  %v1157_v26 = vsel %vm1155_vm11, %v1145_v13, 2102212464  ;;  %v1161_v4 = vsel %vm1155_vm11, %v1148_v15, 920167782 }
 0x2c7   : > { %v1162_v29 = vsel %vm1154_vm10, %v1145_v13, %v1161_v4  ;;  %v1164_v37 = vsel %vm1152_vm7, %v1142_v56, %v1145_v13  ;;  %v1165_v36 = vsel %vm1155_vm11, %v1151_v34, 1326507024  ;;  %vm810_vm12 = vcmp.lt.s32.totalorder %v2284_v2, 0 }
 0x2c8   : > { %vm1448_vm8 = vcmp.lt.s32.totalorder %v1447_v6, 0  ;;  %v874_v9 = vsub.s32 0, %v2401_v35  ;;  %v1163_v58 = vsel %vm1153_vm9, %v1160_v53, %v1162_v29  ;;  %v1156_v51 = vsel %vm1152_vm7, %v1136_v31, %v1139_v10 }
 0x2c9   : > { %v983_v22 = vsel %vm1448_vm8, 0, %v1447_v6  ;;  %v1158_v33 = vsel %vm1154_vm10, %v1142_v56, %v1157_v26  ;;  %v1449_v52 = vadd.s32 4294967169, %v1020_v0  ;;  %v999_v61 = vsel %vm914_vm6, %v998_v17, %v2369_v3 }
 0x2ca   : > { %v984_v11 = vsub.s32 32, %v983_v22  ;;  %v988_v23 = vsub.s32 4294967266, %v983_v22  ;;  %v985_v49 = vshll.u32 %v976_v30, %v983_v22  ;;  %v1442_v45 = vmin.u32 %v874_v9, %v2401_v35 }
 0x2cb   : > { %v1166_v8 = vsel %vm1154_vm10, %v1148_v15, %v1165_v36  ;;  %v2425_v5 = vmul.u32.u64.low %v2384_v59, %v1163_v58  ;;  %v2426_v54 = vmul.u32.u64.high %v2384_v59, %v1163_v58, %v2425_v5  ;;  %v1159_v18 = vsel %vm1153_vm9, %v1156_v51, %v1158_v33 }
 0x2cc   : > { %v986_v63 = vshrl.u32 %v968_v62, %v984_v11  ;;  %v989_v27 = vadd.s32 127, %v988_v23  ;;  %v876_v43 = vclz %v1442_v45  ;;  %v1167_v25 = vsel %vm1153_vm9, %v1164_v37, %v1166_v8 }
 0x2cd   : > { %v2431_v0 = vmul.u32.u64.low %v2384_v59, %v1167_v25  ;;  %v2432_v62 = vmul.u32.u64.high %v2384_v59, %v1167_v25, %v2431_v0  ;;  %v1001_v3 = vsel %vm2406_vm13, 0, %v999_v61  ;;  %v864_v7 = vadd.s32 %v2358_v19, %v2364_v41 }
 0x2ce   : > { %v987_v30 = vor.u32 %v986_v63, %v985_v49  ;;  %v990_v40 = vshll.u32 %v989_v27, 23  ;;  %v1443_v12 = vadd.s32 4294967294, %v876_v43  ;;  %v1026_v10 = vadd.s32 1, %v1449_v52 }
 0x2cf   : > { %v894_v15 = vsub.s32 4, %v2388_v50  ;;  %v1175_v17 = vmul.u32 %v2384_v59, %v1159_v18  ;;  %v1178_v31 = vadd.s32 1, %v2426_v54  ;;  %vm1177_vm15 = vc.u32 %v2432_v62, %v2425_v5 }
 0x2d0   : > { %v991_v14 = vor.u32 4788187, %v990_v40  ;;  %vm1444_vm14 = vcmp.lt.s32.totalorder %v1443_v12, 0  ;;  %v994_v6 = vcvt.s32.f32 %v987_v30  ;;  %vm1027_vm0 = vcmp.gt.s32.totalorder %v1026_v10, 0 }
 0x2d1   : > { %v879_v13 = vsel %vm1444_vm14, 0, %v1443_v12  ;;  %v1179_v9 = vsel %vm1177_vm15, %v1178_v31, %v2426_v54  ;;  %v1028_v53 = vsel %vm1027_vm0, %v1026_v10, 0  ;;  %v895_v23 = vsel %vm810_vm12, %v894_v15, %v2388_v50 }
 0x2d2   : > { %v992_v56 = vand.u32 2147483647, %v991_v14  ;;  %v880_v16 = vsub.s32 32, %v879_v13  ;;  %v884_v47 = vsub.s32 4294967266, %v879_v13  ;;  %v881_v22 = vshll.u32 %v2401_v35, %v879_v13 }
 0x2d3   : > { %v1180_v59 = vadd.s32 %v1179_v9, %v1175_v17  ;;  %v1030_v26 = vand.u32 31, %v1028_v53  ;;  %v1005_v4 = vadd.s32 3, %v1001_v3  ;;  %vm2452_vm1 = vcmp.le.f32.partialorder %v808_v57, 0.7853982 }
 0x2d4   : > { %v995_v34 = vmul.f32 %v994_v6, %v992_v56  ;;  %v882_v19 = vshrl.u32 %v864_v7, %v880_v16  ;;  %v885_v41 = vadd.s32 127, %v884_v47  ;;  %v897_v58 = vsel %vm2452_vm1, 0, %v895_v23 }
 0x2d5   : > { %v1181_v37 = vadd.s32 536870912, %v1180_v59  ;;  %v1031_v63 = vsub.s32 32, %v1030_v26  ;;  %v1023_v43 = vand.u32 8388607, %v1016_v24  ;;  %v1006_v57 = vand.u32 3, %v1005_v4 }
 0x2d6   : > { %v996_v11 = vxor.u32 2147483648, %v995_v34  ;;  %v883_v49 = vor.u32 %v882_v19, %v881_v22  ;;  %v886_v45 = vshll.u32 %v885_v41, 23  ;;  %v901_v52 = vadd.s32 3, %v897_v58 }
 0x2d7   : > { %v2461_v36 = vshrl.u32 %v1181_v37, 30  ;;  %v1034_v39 = vshrl.u32 %v1821_v42, %v1031_v63  ;;  %v1037_v40 = vshrl.u32 %v1822_v44, %v1031_v63  ;;  %v1040_v8 = vshrl.u32 %v1823_v46, %v1031_v63 }
 0x2d8   : > { %v997_v35 = vsel %vm914_vm6, %v996_v11, %v995_v34  ;;  %v887_v27 = vor.u32 4788187, %v886_v45  ;;  %v890_v33 = vcvt.s32.f32 %v883_v49  ;;  %v1042_v12 = vshll.u32 %v1823_v46, %v1030_v26 }
 0x2d9   : > { %v1000_v50 = vsel %vm2406_vm13, %v2280_v20, %v997_v35  ;;  %v1183_v30 = vshll.u32 %v2461_v36, 30  ;;  %v1043_v25 = vshrl.u32 %v1824_v48, %v1031_v63  ;;  %v2473_v14 = vshrl.u32 %v1028_v53, 5 }
 0x2da   : > { %1668 = vcosq.f32 %v1000_v50  ;;  %v888_v51 = vand.u32 2147483647, %v887_v27  ;;  %v1033_v18 = vshll.u32 %v1820_v38, %v1030_v26  ;;  %v1036_v0 = vshll.u32 %v1821_v42, %v1030_v26 }
 0x2db   : > { %1670 = vsinq.f32 %v1000_v50  ;;  %v2471_v54 = vsub.s32 %v1180_v59, %v1183_v30  ;;  %vm1008_vm2 = vcmp.eq.s32.totalorder %v1006_v57, 0  ;;  %v1039_v7 = vshll.u32 %v1822_v44, %v1030_v26 }
 0x2dc   : > { %v891_v61 = vmul.f32 %v890_v33, %v888_v51  ;;  %v1044_v10 = vor.u32 %v1043_v25, %v1042_v12  ;;  %v1046_v56 = vshrl.u32 %v1825_v55, %v1031_v63  ;;  %vm1007_vm3 = vcmp.lt.s32.totalorder %v1006_v57, 2 }
 0x2dd   : > { %vm1011_vm4 = vcmp.eq.s32.totalorder %v1006_v57, 2  ;;  %v1186_v46 = vsub.s32 0, %v2471_v54  ;;  %v1024_v6 = vor.u32 8388608, %v1023_v43  ;;  %v1035_v13 = vor.u32 %v1034_v39, %v1033_v18 }
 0x2de   : > { %v892_v3 = vxor.u32 2147483648, %v891_v61  ;;  %vm1004_vm5 = vweird.f32 %v2280_v20  ;;  %v1038_v16 = vor.u32 %v1037_v40, %v1036_v0  ;;  %v1041_v42 = vor.u32 %v1040_v8, %v1039_v7 }
 0x2df   : > { %v1045_v47 = vshll.u32 %v1824_v48, %v1030_v26  ;;  %v2487_v55 = vand.u32 3, %v901_v52  ;;  %v1454_v17 = vmin.u32 %v1186_v46, %v2471_v54  ;;  %vm1051_vm6 = vcmp.lt.s32.totalorder %v2473_v14, 4 }
 0x2e0   : > { %v893_v15 = vsel %vm810_vm12, %v892_v3, %v891_v61  ;;  %v1176_v31 = vadd.s32 %v2425_v5, %v2432_v62  ;;  %v1057_v22 = vsel %vm1051_vm6, %v1044_v10, 920167782  ;;  %vm1048_vm7 = vcmp.lt.s32.totalorder %v2473_v14, 1 }
 0x2e1   : > { %v896_v44 = vsel %vm2452_vm1, %v2284_v2, %v893_v15  ;;  %v1047_v34 = vor.u32 %v1046_v56, %v1045_v47  ;;  %v1188_v48 = vclz %v1454_v17  ;;  %vm1050_vm13 = vcmp.lt.s32.totalorder %v2473_v14, 3  ;;  %v1233_v17 = vld [vmem:[#allocation2 + $0x20] sm:$0xff] }
 0x2e2   : > { %1672 = vcosq.f32 %v896_v44  ;;  %v1056_v53 = vsel %vm1048_vm7, %v1035_v13, %v1038_v16  ;;  %v1058_v11 = vsel %vm1050_vm13, %v1041_v42, %v1057_v22  ;;  %v1064_v5 = vshll.u32 %v1024_v6, 8 }
 0x2e3   : > { %1674 = vsinq.f32 %v896_v44  ;;  %v1455_v23 = vadd.s32 4294967294, %v1188_v48  ;;  %v1032_v59 = vshrl.u32 %v1820_v38, %v1031_v63  ;;  %vm1049_vm8 = vcmp.lt.s32.totalorder %v2473_v14, 2 }
 0x2e4   : > { %v1669_v19 = vpop.eup %1668  ;;  %v1053_v4 = vsel %vm1051_vm6, %v1041_v42, 2102212464  ;;  %v1060_v49 = vsel %vm1048_vm7, %v1038_v16, %v1041_v42  ;;  %v1061_v45 = vsel %vm1051_vm6, %v1047_v34, 1326507024  ;;  %v1059_v29 = vsel %vm1049_vm8, %v1056_v53, %v1058_v11 }
 0x2e5   : > { %v1671_v41 = vpop.eup %1670  ;;  %v1012_v9 = vxor.u32 2147483648, %v1669_v19  ;;  %vm1456_vm9 = vcmp.lt.s32.totalorder %v1455_v23, 0  ;;  %v1062_v38 = vsel %vm1050_vm13, %v1044_v10, %v1061_v45  ;;  %v1052_v50 = vsel %vm1048_vm7, %v1032_v59, %v1035_v13 }
 0x2e6   : > { %v1009_v62 = vxor.u32 2147483648, %v1671_v41  ;;  %v1191_v63 = vsel %vm1456_vm9, 0, %v1455_v23  ;;  %v1063_v27 = vsel %vm1049_vm8, %v1060_v49, %v1062_v38  ;;  %v1054_v33 = vsel %vm1050_vm13, %v1038_v16, %v1053_v4 }
 0x2e7   : > { %v1013_v26 = vsel %vm1011_vm4, %v1012_v9, %v1671_v41  ;;  %v1192_v43 = vsub.s32 32, %v1191_v63  ;;  %v1196_v51 = vsub.s32 4294967266, %v1191_v63  ;;  %v1193_v40 = vshll.u32 %v2471_v54, %v1191_v63 }
 0x2e8   : > { %v1010_v35 = vsel %vm1008_vm2, %v1669_v19, %v1009_v62  ;;  %v2526_v52 = vmul.u32.u64.low %v1064_v5, %v1063_v27  ;;  %v2527_v30 = vmul.u32.u64.high %v1064_v5, %v1063_v27, %v2526_v52  ;;  %v1055_v20 = vsel %vm1049_vm8, %v1052_v50, %v1054_v33 }
 0x2e9   : > { %v1014_v37 = vsel %vm1007_vm3, %v1010_v35, %v1013_v26  ;;  %v2529_v57 = vmul.u32.u64.low %v1064_v5, %v1059_v29  ;;  %v2530_v39 = vmul.u32.u64.high %v1064_v5, %v1059_v29, %v2529_v57  ;;  %v1194_v61 = vshrl.u32 %v1176_v31, %v1192_v43 }
 0x2ea   : > { %v2522_v58 = vsel %vm1004_vm5, nan, %v1014_v37  ;;  %v1197_v8 = vadd.s32 127, %v1196_v51  ;;  %vm907_vm10 = vcmp.eq.s32.totalorder %v2487_v55, 2  ;;  %vm904_vm12 = vcmp.eq.s32.totalorder %v2487_v55, 0 }
 0x2eb   : > { %v1195_v0 = vor.u32 %v1194_v61, %v1193_v40  ;;  %vm1073_vm11 = vc.u32 %v2527_v30, %v2529_v57  ;;  %v1074_v10 = vadd.s32 1, %v2530_v39  ;;  %v1071_v46 = vmul.u32 %v1064_v5, %v1055_v20 }
 0x2ec   : > { %v1673_v12 = vpop.eup %1672  ;;  %v1198_v3 = vshll.u32 %v1197_v8, 23  ;;  %vm900_vm14 = vweird.f32 %v2284_v2  ;;  %vm903_vm15 = vcmp.lt.s32.totalorder %v2487_v55, 2  ;;  %v1206_v44 = vsub.s32 4, %v2461_v36 }
 0x2ed   : > { %v1675_v25 = vpop.eup %1674  ;;  %v908_v18 = vxor.u32 2147483648, %v1673_v12  ;;  %v1075_v6 = vsel %vm1073_vm11, %v1074_v10, %v2530_v39  ;;  %v1202_v16 = vcvt.s32.f32 %v1195_v0  ;;  %vm1122_vm0 = vcmp.lt.s32.totalorder %v2292_v28, 0 }
 0x2ee   : > { %v905_v7 = vxor.u32 2147483648, %v1675_v25  ;;  %v1199_v56 = vor.u32 4788187, %v1198_v3  ;;  %v1076_v42 = vadd.s32 %v1075_v6, %v1071_v46  ;;  %v1207_v55 = vsel %vm1122_vm0, %v1206_v44, %v2461_v36 }
 0x2ef   : > { %v909_v54 = vsel %vm907_vm10, %v908_v18, %v1675_v25  ;;  %vm1121_vm1 = vcmp.le.f32.partialorder %v1120_v60, 0.7853982  ;;  %v1072_v35 = vadd.s32 %v2529_v57, %v2527_v30  ;;  %vm1212_vm6 = vweird.f32 %v2292_v28 }
 0x2f0   : > { %v906_v14 = vsel %vm904_vm12, %v1673_v12, %v905_v7  ;;  %v1200_v15 = vand.u32 2147483647, %v1199_v56  ;;  %v1077_v34 = vadd.s32 536870912, %v1076_v42  ;;  %v1209_v53 = vsel %vm1121_vm1, 0, %v1207_v55 }
 0x2f1   : > { %v910_v13 = vsel %vm903_vm15, %v906_v14, %v909_v54  ;;  %v1213_v62 = vadd.s32 3, %v1209_v53  ;;  %vm1018_vm7 = vcmp.lt.s32.totalorder %v2294_v32, 0  ;;  %vm1017_vm13 = vcmp.le.f32.partialorder %v1016_v24, 0.7853982 }
 0x2f2   : > { %v911_v47 = vsel %vm900_vm14, nan, %v910_v13  ;;  %v1203_v31 = vmul.f32 %v1202_v16, %v1200_v15  ;;  %v1078_v2 = vshrl.u32 %v1077_v34, 30  ;;  %vm1108_vm11 = vweird.f32 %v2294_v32  ;;  %v1228_v15 = vld [vmem:[#allocation6 + $0x40] sm:$0xff] }
 0x2f3   : > { %v1546_v22 = vpack.c.bf16 %v911_v47, %v1233_v17  ;;  %v1214_v26 = vand.u32 3, %v1213_v62  ;;  %vm1238_vm12 = vcmask 588800  }
 0x2f4   : > { %v1204_v19 = vxor.u32 2147483648, %v1203_v31  ;;  %v1079_v41 = vshll.u32 %v1078_v2, 30  ;;  %v1102_v30 = vsub.s32 4, %v1078_v2 }
 0x2f5   : > { %1547 = vmatpush3.bf16.msra.mxu0 %v1546_v22  ;;  %vm1219_vm3 = vcmp.eq.s32.totalorder %v1214_v26, 2  ;;  %vm1215_vm4 = vcmp.lt.s32.totalorder %v1214_v26, 2  ;;  %vm1216_vm5 = vcmp.eq.s32.totalorder %v1214_v26, 0 }
 0x2f6   : > { %1548 = vmatprep.subr.bf16.mxu0 %v1826_v21  ;;  %v1205_v48 = vsel %vm1122_vm0, %v1204_v19, %v1203_v31  ;;  %v1080_v11 = vsub.s32 %v1076_v42, %v1079_v41  ;;  %v1103_v25 = vsel %vm1018_vm7, %v1102_v30, %v1078_v2 }
 0x2f7   : > { %v1208_v9 = vsel %vm1121_vm1, %v2292_v28, %v1205_v48  ;;  %v1105_v28 = vsel %vm1017_vm13, 0, %v1103_v25 }
 0x2f8   : > { %1676 = vcosq.f32 %v1208_v9  ;;  %v1082_v5 = vsub.s32 0, %v1080_v11  ;;  %v1109_v0 = vadd.s32 3, %v1105_v28 }
 0x2f9   : > { %1678 = vsinq.f32 %v1208_v9 }
 0x2fa   : > { %v1450_v23 = vmin.u32 %v1082_v5, %v1080_v11  ;;  %v1110_v3 = vand.u32 3, %v1109_v0 }
 0x2fc   : > { %v1084_v59 = vclz %v1450_v23  ;;  %vm1115_vm8 = vcmp.eq.s32.totalorder %v1110_v3, 2  ;;  %vm1112_vm9 = vcmp.eq.s32.totalorder %v1110_v3, 0  ;;  %vm1111_vm10 = vcmp.lt.s32.totalorder %v1110_v3, 2 }
 0x2fe   : > { %v1451_v4 = vadd.s32 4294967294, %v1084_v59 }
 0x300   : > { %vm1452_vm2 = vcmp.lt.s32.totalorder %v1451_v4, 0 }
 0x301   : > { %v1087_v60 = vsel %vm1452_vm2, 0, %v1451_v4 }
 0x302   : > { %v1677_v36 = vpop.eup %1676  ;;  %v1088_v29 = vsub.s32 32, %v1087_v60  ;;  %v1092_v38 = vsub.s32 4294967266, %v1087_v60  ;;  %v1089_v50 = vshll.u32 %v1080_v11, %v1087_v60 }
 0x303   : > { %v1679_v21 = vpop.eup %1678  ;;  %v1220_v49 = vxor.u32 2147483648, %v1677_v36 }
 0x304   : > { %v1217_v45 = vxor.u32 2147483648, %v1679_v21  ;;  %v1090_v27 = vshrl.u32 %v1072_v35, %v1088_v29  ;;  %v1093_v43 = vadd.s32 127, %v1092_v38 }
 0x305   : > { %v1221_v37 = vsel %vm1219_vm3, %v1220_v49, %v1679_v21 }
 0x306   : > { %v1218_v63 = vsel %vm1216_vm5, %v1677_v36, %v1217_v45  ;;  %v1091_v52 = vor.u32 %v1090_v27, %v1089_v50  ;;  %v1094_v39 = vshll.u32 %v1093_v43, 23 }
 0x307   : > { %v1222_v51 = vsel %vm1215_vm4, %v1218_v63, %v1221_v37 }
 0x308   : > { %v1223_v33 = vsel %vm1212_vm6, nan, %v1222_v51  ;;  %v1095_v40 = vor.u32 4788187, %v1094_v39  ;;  %v1098_v8 = vcvt.s32.f32 %v1091_v52 }
 0x30a   : > { %v1096_v61 = vand.u32 2147483647, %v1095_v40 }
 0x30c   : > { %v1099_v12 = vmul.f32 %v1098_v8, %v1096_v61 }
 0x30e   : > { %v1100_v57 = vxor.u32 2147483648, %v1099_v12 }
 0x310   : > { %v1101_v20 = vsel %vm1018_vm7, %v1100_v57, %v1099_v12 }
 0x311   : > { %v1104_v18 = vsel %vm1017_vm13, %v2294_v32, %v1101_v20 }
 0x312   : > { %1680 = vcosq.f32 %v1104_v18 }
 0x313   : > { %1682 = vsinq.f32 %v1104_v18 }
 0x31c   : > { %v1681_v7 = vpop.eup %1680 }
 0x31d   : > { %v1683_v10 = vpop.eup %1682  ;;  %v1116_v54 = vxor.u32 2147483648, %v1681_v7 }
 0x31e   : > { %v1113_v56 = vxor.u32 2147483648, %v1683_v10 }
 0x31f   : > { %v1117_v46 = vsel %vm1115_vm8, %v1116_v54, %v1683_v10 }
 0x320   : > { %v1114_v24 = vsel %vm1112_vm9, %v1681_v7, %v1113_v56 }
 0x321   : > { %v1118_v14 = vsel %vm1111_vm10, %v1114_v24, %v1117_v46 }
 0x322   : > { %v1119_v6 = vsel %vm1108_vm11, nan, %v1118_v14 }
 0x323   : > { %v1549_v13 = vpack.c.bf16 %v1119_v6, %v2522_v58 }
 0x325   : > { %1550 = vmatpush3.bf16.msra.mxu0 %v1549_v13 }
 0x326   : > { %1526 = vmatprep.subr.mxu0 %v1819_v1 }
 0x329   : > { %1527 = vmatpush3.msra.mxu0 %v1223_v33 }
 0x32a   : > { %1529 = vmatmul.mubr.msk.f32.vlgmr.msra.gmra.mrb[0].mxu0 %vm1238_vm12, %v1228_v15 }
 0x3fd   : > { %v1308_v1 = vpop.f32.mrb[0].mxu0 }
 0x3fe   : > { %1312 = vst [vmem:[%s173_s17] sm:$0xff] %v1308_v1  ;;  %v1530_v32 = vpop.f32.mrb[1].mxu0 }
 0x3ff   : > { %1755 = shalt.err (!%p1752_p7)
}
 0x400   : > { %s1756_s7 = scalar_lea.hbm %s2565_s30, 128  ;;  %s1760_s25 = scalar_lea.hbm %s2609_s2, 256 }
 0x401   : > { %p1757_p9 = scmp.ne.s32.totalorder %s2565_s30, %s1756_s7  ;;  %p1761_p0 = scmp.lt.u32.totalorder %s2565_s30, %s2609_s2 }
 0x402   : > { %p1762_p1 = scmp.lt.u32.totalorder %s1760_s25, %s1756_s7  ;;  %p1764_p4 = scmp.lt.u32.totalorder %s1756_s7, %s2565_s30 }
 0x403   : > { %p1758_p2 = pnand %p1757_p9, %p1935_p12 }
 0x404   : > { %p1763_p11 = por %p1762_p1, %p1761_p0 }
 0x405   : > { %p1759_p5 = pneg %p1758_p2 }
 0x406   : > { %p1765_p6 = por %p1764_p4, %p1763_p11 }
 0x408   : > { %p1766_p8 = pnand %p1765_p6, %p1759_p5 }
 0x40a   : > { %1769 = shalt.err (!%p1766_p8)
}
 0x40b   : > { %1589 = dma.vmem_to_hbm [thread:$0]  (%p1935_p12), %s2560_s27, 128, %s2565_s30, %s1314_s3  }
 0x40c PF: > { %s1339_s19 = sand.u32 1, %s1800_s9   ;;  %p2632_p10 = scmp.ne.s32.totalorder %s2614_s16, 0 }
 0x40d   : > { %p2633_p13 = scmp.ge.s32.totalorder %s1812_s12, 2  ;;  %s1340_s29 = scalar_lea.sflag [#allocation5], %s1339_s19 }
 0x40f   : > { %p1600_p3 = pnand %p2633_p13, %p2632_p10 }
 0x411   : > { %1795 = dma.done.wait (!%p1600_p3), %s1340_s29, 128  }
 0x412   : > { %1797 = vsyncadd (!%p1600_p3), %s1340_s29, 4294967168  ;;  %p16_p7 = scmp.ge.s32.totalorder %s1900_s21, 4   ;;  %s2634_s9 = smov %s1804_s10 }
 0x413   : > { %s2635_s10 = smov %s1808_s11  ;;  %s2636_s11 = smov %s1931_s8 }
 0x414   : > { %s2637_s12 = smov %s1900_s21  ;;  %18 = sbr.rel (!%p16_p7) target bundleno = 6 (0x6), region = 77 }
 0x41b   :  { %1345 = vsyncpa [#allocation4], 1 }
 0x41c   :  { %1347 = vsyncpa [#allocation4 + $0x1], 1 }
 0x41d   :  { %1348 = vsyncpa [#allocation7], 1 }
 0x41e   :  { %1349 = vsyncpa [#allocation5], 1 }
 0x41f   :  { %1351 = vsyncpa [#allocation5 + $0x1], 1 }

</bundles_post_ra>
